<compile_context>
chip_gen: v7x
topology: tpu7x:2x2x1
jax: 0.10.0
libtpu: 0.0.40
codegen_flags: <defaults>
</compile_context>

<pallas_src>
import jax
import jax.numpy as jnp
from jax import lax
from jax.experimental import pallas as pl
from jax.experimental.pallas import tpu as pltpu


# ----------------------------------------------------------------------------
# Generation-aware VMEM budgeting and tiling helpers
# ----------------------------------------------------------------------------
def _tpu_vmem_capacity_bytes():
    try:
        info = pltpu.get_tpu_info()
        cap = getattr(info, "vmem_capacity_bytes", None)
        if cap:
            return int(cap)
    except Exception:
        pass
    return 64 << 20          # conservative fallback (v7x per-TC)


def _block_budget_bytes(cap):
    # v7x (64 MiB/TC): keep double-buffered residency near 32 MiB with headroom
    # for compiler-internal scratch.  v5e/v6e (128 MiB physical): use ~96 MiB.
    return (32 << 20) if cap <= (80 << 20) else (96 << 20)


def _vmem_limit_bytes(block_elems_f32):
    # Double-buffered f32 blocks + headroom; never below the 32 MiB default.
    # Tile selection keeps this under the per-generation ceiling; if even the
    # smallest legal tile overflows we grow the limit and fail loudly instead
    # of silently mis-tiling.
    need = 2 * 4 * block_elems_f32 + (4 << 20)
    return int(max(need, 32 << 20))


def _pick_hw_tile(hw, max_thw):
    """Largest lane-dense (multiple-of-128) divisor of hw not exceeding max_thw."""
    if hw % 128 != 0 or hw <= max_thw:
        return hw
    t = min((max_thw // 128) * 128, hw)
    while t >= 128:
        if hw % t == 0:
            return t
        t -= 128
    return 128


def _pick_spectral_tiles(cin, cout, hw, budget_bytes):
    """Joint (ct, thw) search: prefer full Cout (weights DMA'd once, x streamed
    once), then the largest lane-dense HW tile that fits the budget."""
    def resident(ct, thw):
        # xr+xi, wr+wi, mask, out_r+out_i blocks (f32), double-buffered.
        elems = 2 * cin * thw + 2 * cin * ct * thw + thw + 2 * ct * thw
        return 2 * 4 * elems

    ct_cands = [cout]
    c = (cout // 8) * 8
    while c >= 8:
        if c != cout and cout % c == 0:
            ct_cands.append(c)
        c -= 8
    if hw % 128 == 0:
        thw_cands = [t for t in range(hw, 127, -128) if hw % t == 0]
    else:
        thw_cands = [hw]

    for ct in ct_cands:
        for thw in thw_cands:
            if resident(ct, thw) <= budget_bytes:
                return ct, thw
    # Nothing fits: return the smallest legal tile; vmem_limit_bytes will grow
    # accordingly (compile fails loudly if the shape is truly infeasible).
    return ct_cands[-1], thw_cands[-1]


# ----------------------------------------------------------------------------
# Kernel 1: frequency-domain channel mixing (complex) + band-stop mask.
#   out[b, o, hw] = mask[hw] * sum_i x[b, i, hw] * w[i, o, hw]   (complex mul)
# ----------------------------------------------------------------------------
_SPECTRAL_STATIC_UNROLL_MAX = 16


def _make_spectral_mix_kernel(cin):
    def kernel(xr_ref, xi_ref, wr_ref, wi_ref, mask_ref, or_ref, oi_ref):
        # xr/xi: (1, Cin, thw)  wr/wi: (Cin, ct, thw)  mask: (1, thw)  out: (1, ct, thw)
        ct, thw = wr_ref.shape[1], wr_ref.shape[2]
        acc_r = jnp.zeros((ct, thw), jnp.float32)
        acc_i = jnp.zeros((ct, thw), jnp.float32)

        if cin <= _SPECTRAL_STATIC_UNROLL_MAX:
            # Fully static slices: one x row (sublane-broadcast) FMA'd against a
            # full (ct, thw) weight slab per input channel.
            for i in range(cin):
                xr_i = xr_ref[0, i:i + 1, :]          # (1, thw)
                xi_i = xi_ref[0, i:i + 1, :]
                wr_i = wr_ref[i]                      # (ct, thw), leading-dim index
                wi_i = wi_ref[i]
                acc_r = acc_r + (xr_i * wr_i - xi_i * wi_i)
                acc_i = acc_i + (xr_i * wi_i + xi_i * wr_i)
        else:
            def body(i, carry):
                a_r, a_i = carry
                xr_i = xr_ref[0, pl.ds(i, 1), :]      # (1, thw)
                xi_i = xi_ref[0, pl.ds(i, 1), :]
                wr_i = wr_ref[i]                      # (ct, thw)
                wi_i = wi_ref[i]
                return (a_r + (xr_i * wr_i - xi_i * wi_i),
                        a_i + (xr_i * wi_i + xi_i * wr_i))
            acc_r, acc_i = lax.fori_loop(0, cin, body, (acc_r, acc_i), unroll=8)

        # Channel-uniform 0/1 band-stop mask folded in once, then a single
        # full-block (lane- and sublane-dense) store per output.
        mask = mask_ref[...]                          # (1, thw)
        or_ref[0] = acc_r * mask
        oi_ref[0] = acc_i * mask
    return kernel


def spectral_mix(xr, xi, wr, wi, mask):
    # xr/xi: (B, Cin, HW)  wr/wi: (Cin, Cout, HW)  mask: (1, HW)
    B, Cin, HW = xr.shape
    Cout = wr.shape[1]
    cap = _tpu_vmem_capacity_bytes()
    ct, thw = _pick_spectral_tiles(Cin, Cout, HW, _block_budget_bytes(cap))
    n_hw = HW // thw
    n_ct = Cout // ct
    block_elems = 2 * Cin * thw + 2 * Cin * ct * thw + thw + 2 * ct * thw

    out_struct = jax.ShapeDtypeStruct((B, Cout, HW), jnp.float32)
    return pl.pallas_call(
        _make_spectral_mix_kernel(Cin),
        out_shape=(out_struct, out_struct),
        # Cout tiles outermost, batch innermost: each weight block is DMA'd once
        # and revisited across b.
        grid=(n_ct, n_hw, B),
        in_specs=[
            pl.BlockSpec((1, Cin, thw), lambda c, h, b: (b, 0, h)),
            pl.BlockSpec((1, Cin, thw), lambda c, h, b: (b, 0, h)),
            pl.BlockSpec((Cin, ct, thw), lambda c, h, b: (0, c, h)),
            pl.BlockSpec((Cin, ct, thw), lambda c, h, b: (0, c, h)),
            pl.BlockSpec((1, thw), lambda c, h, b: (0, h)),
        ],
        out_specs=(
            pl.BlockSpec((1, ct, thw), lambda c, h, b: (b, c, h)),
            pl.BlockSpec((1, ct, thw), lambda c, h, b: (b, c, h)),
        ),
        compiler_params=pltpu.CompilerParams(
            # b is "arbitrary" so a v7x megacore split lands on the c/h axes and
            # the grid-invariant weight blocks are not re-streamed per core.
            dimension_semantics=("parallel", "parallel", "arbitrary"),
            vmem_limit_bytes=_vmem_limit_bytes(block_elems),
        ),
    )(xr, xi, wr, wi, mask)


# ----------------------------------------------------------------------------
# Kernel 2: 1x1 conv + rate combine, lane-dense (B, C, H*W) layout.
#   y = rate1 * spectral + rate2 * (w0 @ x + b)
# ----------------------------------------------------------------------------
def _make_conv_combine_kernel(cin, use_mxu):
    def kernel(rates_ref, x_ref, spec_ref, w_ref, b_ref, o_ref):
        # rates: SMEM (2,)  x: (1, Cin, thw)  spec: (1, Cout, thw)  w: (Cout, Cin)  b: (Cout, 1)
        if use_mxu:
            out2 = jnp.dot(w_ref[...], x_ref[0], preferred_element_type=jnp.float32)
        else:
            # Small-channel 1x1 conv as VPU broadcast-FMA: keeps the MXU/MRF off
            # the critical path (the kernel is mem-bound either way).
            out2 = w_ref[:, 0:1] * x_ref[0, 0:1, :]
            for i in range(1, cin):
                out2 = out2 + w_ref[:, i:i + 1] * x_ref[0, i:i + 1, :]
        out2 = out2 + b_ref[...]
        o_ref[0] = rates_ref[0] * spec_ref[0] + rates_ref[1] * out2
    return kernel


def conv_combine(x, spec, w0, bias, rates):
    B, Cin, HW = x.shape
    Cout = w0.shape[0]
    cap = _tpu_vmem_capacity_bytes()
    budget = _block_budget_bytes(cap)
    # Residency per step (double-buffered f32): x + spec + out blocks dominate.
    per_thw_bytes = 2 * 4 * (Cin + 2 * Cout)
    max_thw = max(128, budget // max(per_thw_bytes, 1))
    thw = _pick_hw_tile(HW, max_thw)
    n_hw = HW // thw
    block_elems = Cin * thw + 2 * Cout * thw + Cout * Cin + Cout
    use_mxu = Cin > 16

    return pl.pallas_call(
        _make_conv_combine_kernel(Cin, use_mxu),
        out_shape=jax.ShapeDtypeStruct((B, Cout, HW), jnp.float32),
        grid=(B, n_hw),
        in_specs=[
            pl.BlockSpec(memory_space=pltpu.MemorySpace.SMEM),        # rates (scalars)
            pl.BlockSpec((1, Cin, thw), lambda b, h: (b, 0, h)),      # x
            pl.BlockSpec((1, Cout, thw), lambda b, h: (b, 0, h)),     # spectral branch
            pl.BlockSpec((Cout, Cin), lambda b, h: (0, 0)),           # 1x1 conv weight
            pl.BlockSpec((Cout, 1), lambda b, h: (0, 0)),             # bias
        ],
        out_specs=pl.BlockSpec((1, Cout, thw), lambda b, h: (b, 0, h)),
        compiler_params=pltpu.CompilerParams(
            dimension_semantics=("parallel", "parallel"),
            vmem_limit_bytes=_vmem_limit_bytes(block_elems),
        ),
    )(rates, x, spec, w0, bias)


# ----------------------------------------------------------------------------
# FAM_Module forward
# ----------------------------------------------------------------------------
def fam_forward(x, params, cuton=0.1):
    B, Cin, H, W = x.shape
    assert H % 2 == 0 and W % 2 == 0, "band-stop mask fold assumes even spatial dims"
    HW = H * W
    Cout = params["w1_real"].shape[1]

    # Weights keep their native (Cin, Cout, H, W) layout; the flatten to
    # (Cin, Cout, H*W) is a contiguous reshape (no HBM transpose pass).
    wr = params["w1_real"].reshape(Cin, Cout, HW)
    wi = params["w1_imag"].reshape(Cin, Cout, HW)

    # TODO(synk): fft2 / ifft2 have no Pallas primitive; computed with jnp.fft (XLA).
    x_ft = jnp.fft.fft2(x, norm="ortho")                         # complex64

    # Band-stop mask equivalent to fftshift -> zero center rect -> ifftshift:
    # the channel-axis rolls cancel and the mask is channel-uniform 0/1.
    cy, cx = H // 2, W // 2
    rh, rw = int(cuton * cy), int(cuton * cx)
    mask_s = jnp.ones((H, W), jnp.float32)
    mask_s = mask_s.at[cy - rh:cy + rh, cx - rw:cx + rw].set(0.0)
    mask = jnp.fft.ifftshift(mask_s).reshape(1, HW)

    xr = jnp.real(x_ft).astype(jnp.float32).reshape(B, Cin, HW)
    xi = jnp.imag(x_ft).astype(jnp.float32).reshape(B, Cin, HW)

    ofr, ofi = spectral_mix(xr, xi, wr, wi, mask)                # (B, Cout, HW) each
    out_ft = lax.complex(ofr, ofi).reshape(B, Cout, H, W)
    out = jnp.fft.ifft2(out_ft, s=(H, W), norm="ortho").real.astype(jnp.float32)

    # 1x1 conv + rate combine in (B, C, H*W) layout (reshapes only).
    spec = out.reshape(B, Cout, HW)
    x_flat = x.astype(jnp.float32).reshape(B, Cin, HW)
    w0 = params["w0_weight"][:, :, 0, 0]                         # (Cout, Cin)
    bias = params["w0_bias"].reshape(Cout, 1)
    rates = jnp.stack([params["rate1"], params["rate2"]]).astype(jnp.float32)

    y = conv_combine(x_flat, spec, w0, bias, rates)              # (B, Cout, HW)
    return y.reshape(B, Cout, H, W)


# ----------------------------------------------------------------------------
# Deterministic parameter init (mirrors FAM_Module.__init__ shapes).
# ----------------------------------------------------------------------------
def init_params(key, in_channels, out_channels, shapes):
    k1, k2, k3, k4 = jax.random.split(key, 4)
    scale = 1.0 / (in_channels * out_channels)
    w1_real = scale * jax.random.uniform(k1, (in_channels, out_channels, shapes, shapes), jnp.float32)
    w1_imag = scale * jax.random.uniform(k2, (in_channels, out_channels, shapes, shapes), jnp.float32)
    w0_weight = (jax.random.uniform(k3, (out_channels, in_channels, 1, 1), jnp.float32) - 0.5) * 0.5
    w0_bias = (jax.random.uniform(k4, (out_channels,), jnp.float32) - 0.5) * 0.1
    return dict(
        w1_real=w1_real, w1_imag=w1_imag,
        w0_weight=w0_weight, w0_bias=w0_bias,
        rate1=jnp.float32(0.5), rate2=jnp.float32(0.5),   # init_rate_half
    )


# ----------------------------------------------------------------------------
# Pure-JAX reference mirroring the PyTorch code path (explicit rolls).
# ----------------------------------------------------------------------------
def reference_forward(x, params, cuton=0.1):
    B, Cin, H, W = x.shape
    w = params["w1_real"] + 1j * params["w1_imag"]
    x_ft = jnp.fft.fft2(x, norm="ortho")
    out_ft = jnp.einsum("bixy,ioxy->boxy", x_ft, w)
    shifted = out_ft
    for dim in (1, 2, 3):                      # batch_fftshift2d (incl. channel dim)
        n = shifted.shape[dim] // 2
        if shifted.shape[dim] % 2 != 0:
            n += 1
        shifted = jnp.roll(shifted, -n, axis=dim)
    cy, cx = shifted.shape[2] // 2, shifted.shape[3] // 2
    rh, rw = int(cuton * cy), int(cuton * cx)
    shifted = shifted.at[:, :, cy - rh:cy + rh, cx - rw:cx + rw].set(0)
    for dim in (3, 2, 1):                      # batch_ifftshift2d
        shifted = jnp.roll(shifted, -(shifted.shape[dim] // 2), axis=dim)
    out = jnp.fft.ifft2(shifted, s=(H, W), norm="ortho").real
    w0 = params["w0_weight"][:, :, 0, 0]
    out2 = jnp.einsum("oi,bihw->bohw", w0, x) + params["w0_bias"][None, :, None, None]
    return params["rate1"] * out + params["rate2"] * out2


if __name__ == "__main__":
    B, Cin, Cout, S = 2, 4, 8, 32              # shapes == H == W (required by weights1)
    key = jax.random.PRNGKey(0)
    kx, kp = jax.random.split(key)
    x = jax.random.normal(kx, (B, Cin, S, S), jnp.float32)
    params = init_params(kp, Cin, Cout, S)

    fwd = jax.jit(lambda xx, pp: fam_forward(xx, pp, cuton=0.1))
    y = jax.block_until_ready(fwd(x, params))
    y_ref = jax.block_until_ready(reference_forward(x, params, cuton=0.1))

    assert y.shape == (B, Cout, S, S), y.shape
    err = float(jnp.max(jnp.abs(y - y_ref.astype(jnp.float32))))
    assert jnp.allclose(y, y_ref.astype(jnp.float32), atol=1e-3, rtol=1e-3), err
    print("KERNEL_OK")
</pallas_src>

<mosaic_0001>
module attributes {stable_mosaic.version = 11 : i64} {
  func.func @kernel(%arg0: i32, %arg1: i32, %arg2: i32, %arg3: memref<1x4x1024xf32, #tpu.memory_space<vmem>>, %arg4: memref<1x4x1024xf32, #tpu.memory_space<vmem>>, %arg5: memref<4x8x1024xf32, #tpu.memory_space<vmem>>, %arg6: memref<4x8x1024xf32, #tpu.memory_space<vmem>>, %arg7: memref<1x1024xf32, #tpu.memory_space<vmem>>, %arg8: memref<1x8x1024xf32, #tpu.memory_space<vmem>>, %arg9: memref<1x8x1024xf32, #tpu.memory_space<vmem>>) attributes {dimension_semantics = [#tpu.dimension_semantics<parallel>, #tpu.dimension_semantics<parallel>, #tpu.dimension_semantics<arbitrary>], iteration_bounds = array<i64: 1, 1, 2>, scalar_prefetch = 0 : i64, scratch_operands = 0 : i64, tpu.core_type = #tpu.core_type<tc>, window_params = [{transform_indices = @transform_0, window_bounds = array<i64: 1, 4, 1024>}, {transform_indices = @transform_1, window_bounds = array<i64: 1, 4, 1024>}, {transform_indices = @transform_2, window_bounds = array<i64: 4, 8, 1024>}, {transform_indices = @transform_3, window_bounds = array<i64: 4, 8, 1024>}, {transform_indices = @transform_4, window_bounds = array<i64: 1, 1024>}, {transform_indices = @transform_5, window_bounds = array<i64: 1, 8, 1024>}, {transform_indices = @transform_6, window_bounds = array<i64: 1, 8, 1024>}]} {
    %cst = arith.constant 0.000000e+00 : f32
    %0 = vector.broadcast %cst : f32 to vector<8x1024xf32>
    %cst_0 = arith.constant 0.000000e+00 : f32
    %1 = vector.broadcast %cst_0 : f32 to vector<8x1024xf32>
    %c0 = arith.constant 0 : index
    %c0_1 = arith.constant 0 : index
    %c0_2 = arith.constant 0 : index
    %2 = vector.load %arg3[%c0, %c0_1, %c0_2] : memref<1x4x1024xf32, #tpu.memory_space<vmem>>, vector<1x1x1024xf32>
    %3 = vector.shape_cast %2 : vector<1x1x1024xf32> to vector<1x1024xf32>
    %c0_3 = arith.constant 0 : index
    %c0_4 = arith.constant 0 : index
    %c0_5 = arith.constant 0 : index
    %4 = vector.load %arg4[%c0_3, %c0_4, %c0_5] : memref<1x4x1024xf32, #tpu.memory_space<vmem>>, vector<1x1x1024xf32>
    %5 = vector.shape_cast %4 : vector<1x1x1024xf32> to vector<1x1024xf32>
    %c0_6 = arith.constant 0 : index
    %c0_7 = arith.constant 0 : index
    %c0_8 = arith.constant 0 : index
    %6 = vector.load %arg5[%c0_6, %c0_7, %c0_8] : memref<4x8x1024xf32, #tpu.memory_space<vmem>>, vector<1x8x1024xf32>
    %7 = vector.shape_cast %6 : vector<1x8x1024xf32> to vector<8x1024xf32>
    %c0_9 = arith.constant 0 : index
    %c0_10 = arith.constant 0 : index
    %c0_11 = arith.constant 0 : index
    %8 = vector.load %arg6[%c0_9, %c0_10, %c0_11] : memref<4x8x1024xf32, #tpu.memory_space<vmem>>, vector<1x8x1024xf32>
    %9 = vector.shape_cast %8 : vector<1x8x1024xf32> to vector<8x1024xf32>
    %10 = vector.broadcast %3 : vector<1x1024xf32> to vector<8x1024xf32>
    %11 = arith.mulf %10, %7 : vector<8x1024xf32>
    %12 = vector.broadcast %5 : vector<1x1024xf32> to vector<8x1024xf32>
    %13 = arith.mulf %12, %9 : vector<8x1024xf32>
    %14 = arith.subf %11, %13 : vector<8x1024xf32>
    %15 = arith.addf %0, %14 : vector<8x1024xf32>
    %16 = vector.broadcast %3 : vector<1x1024xf32> to vector<8x1024xf32>
    %17 = arith.mulf %16, %9 : vector<8x1024xf32>
    %18 = vector.broadcast %5 : vector<1x1024xf32> to vector<8x1024xf32>
    %19 = arith.mulf %18, %7 : vector<8x1024xf32>
    %20 = arith.addf %17, %19 : vector<8x1024xf32>
    %21 = arith.addf %1, %20 : vector<8x1024xf32>
    %c0_12 = arith.constant 0 : index
    %c1 = arith.constant 1 : index
    %c0_13 = arith.constant 0 : index
    %22 = vector.load %arg3[%c0_12, %c1, %c0_13] : memref<1x4x1024xf32, #tpu.memory_space<vmem>>, vector<1x1x1024xf32>
    %23 = vector.shape_cast %22 : vector<1x1x1024xf32> to vector<1x1024xf32>
    %c0_14 = arith.constant 0 : index
    %c1_15 = arith.constant 1 : index
    %c0_16 = arith.constant 0 : index
    %24 = vector.load %arg4[%c0_14, %c1_15, %c0_16] : memref<1x4x1024xf32, #tpu.memory_space<vmem>>, vector<1x1x1024xf32>
    %25 = vector.shape_cast %24 : vector<1x1x1024xf32> to vector<1x1024xf32>
    %c1_17 = arith.constant 1 : index
    %c0_18 = arith.constant 0 : index
    %c0_19 = arith.constant 0 : index
    %26 = vector.load %arg5[%c1_17, %c0_18, %c0_19] : memref<4x8x1024xf32, #tpu.memory_space<vmem>>, vector<1x8x1024xf32>
    %27 = vector.shape_cast %26 : vector<1x8x1024xf32> to vector<8x1024xf32>
    %c1_20 = arith.constant 1 : index
    %c0_21 = arith.constant 0 : index
    %c0_22 = arith.constant 0 : index
    %28 = vector.load %arg6[%c1_20, %c0_21, %c0_22] : memref<4x8x1024xf32, #tpu.memory_space<vmem>>, vector<1x8x1024xf32>
    %29 = vector.shape_cast %28 : vector<1x8x1024xf32> to vector<8x1024xf32>
    %30 = vector.broadcast %23 : vector<1x1024xf32> to vector<8x1024xf32>
    %31 = arith.mulf %30, %27 : vector<8x1024xf32>
    %32 = vector.broadcast %25 : vector<1x1024xf32> to vector<8x1024xf32>
    %33 = arith.mulf %32, %29 : vector<8x1024xf32>
    %34 = arith.subf %31, %33 : vector<8x1024xf32>
    %35 = arith.addf %15, %34 : vector<8x1024xf32>
    %36 = vector.broadcast %23 : vector<1x1024xf32> to vector<8x1024xf32>
    %37 = arith.mulf %36, %29 : vector<8x1024xf32>
    %38 = vector.broadcast %25 : vector<1x1024xf32> to vector<8x1024xf32>
    %39 = arith.mulf %38, %27 : vector<8x1024xf32>
    %40 = arith.addf %37, %39 : vector<8x1024xf32>
    %41 = arith.addf %21, %40 : vector<8x1024xf32>
    %c0_23 = arith.constant 0 : index
    %c2 = arith.constant 2 : index
    %c0_24 = arith.constant 0 : index
    %42 = vector.load %arg3[%c0_23, %c2, %c0_24] : memref<1x4x1024xf32, #tpu.memory_space<vmem>>, vector<1x1x1024xf32>
    %43 = vector.shape_cast %42 : vector<1x1x1024xf32> to vector<1x1024xf32>
    %c0_25 = arith.constant 0 : index
    %c2_26 = arith.constant 2 : index
    %c0_27 = arith.constant 0 : index
    %44 = vector.load %arg4[%c0_25, %c2_26, %c0_27] : memref<1x4x1024xf32, #tpu.memory_space<vmem>>, vector<1x1x1024xf32>
    %45 = vector.shape_cast %44 : vector<1x1x1024xf32> to vector<1x1024xf32>
    %c2_28 = arith.constant 2 : index
    %c0_29 = arith.constant 0 : index
    %c0_30 = arith.constant 0 : index
    %46 = vector.load %arg5[%c2_28, %c0_29, %c0_30] : memref<4x8x1024xf32, #tpu.memory_space<vmem>>, vector<1x8x1024xf32>
    %47 = vector.shape_cast %46 : vector<1x8x1024xf32> to vector<8x1024xf32>
    %c2_31 = arith.constant 2 : index
    %c0_32 = arith.constant 0 : index
    %c0_33 = arith.constant 0 : index
    %48 = vector.load %arg6[%c2_31, %c0_32, %c0_33] : memref<4x8x1024xf32, #tpu.memory_space<vmem>>, vector<1x8x1024xf32>
    %49 = vector.shape_cast %48 : vector<1x8x1024xf32> to vector<8x1024xf32>
    %50 = vector.broadcast %43 : vector<1x1024xf32> to vector<8x1024xf32>
    %51 = arith.mulf %50, %47 : vector<8x1024xf32>
    %52 = vector.broadcast %45 : vector<1x1024xf32> to vector<8x1024xf32>
    %53 = arith.mulf %52, %49 : vector<8x1024xf32>
    %54 = arith.subf %51, %53 : vector<8x1024xf32>
    %55 = arith.addf %35, %54 : vector<8x1024xf32>
    %56 = vector.broadcast %43 : vector<1x1024xf32> to vector<8x1024xf32>
    %57 = arith.mulf %56, %49 : vector<8x1024xf32>
    %58 = vector.broadcast %45 : vector<1x1024xf32> to vector<8x1024xf32>
    %59 = arith.mulf %58, %47 : vector<8x1024xf32>
    %60 = arith.addf %57, %59 : vector<8x1024xf32>
    %61 = arith.addf %41, %60 : vector<8x1024xf32>
    %c0_34 = arith.constant 0 : index
    %c3 = arith.constant 3 : index
    %c0_35 = arith.constant 0 : index
    %62 = vector.load %arg3[%c0_34, %c3, %c0_35] : memref<1x4x1024xf32, #tpu.memory_space<vmem>>, vector<1x1x1024xf32>
    %63 = vector.shape_cast %62 : vector<1x1x1024xf32> to vector<1x1024xf32>
    %c0_36 = arith.constant 0 : index
    %c3_37 = arith.constant 3 : index
    %c0_38 = arith.constant 0 : index
    %64 = vector.load %arg4[%c0_36, %c3_37, %c0_38] : memref<1x4x1024xf32, #tpu.memory_space<vmem>>, vector<1x1x1024xf32>
    %65 = vector.shape_cast %64 : vector<1x1x1024xf32> to vector<1x1024xf32>
    %c3_39 = arith.constant 3 : index
    %c0_40 = arith.constant 0 : index
    %c0_41 = arith.constant 0 : index
    %66 = vector.load %arg5[%c3_39, %c0_40, %c0_41] : memref<4x8x1024xf32, #tpu.memory_space<vmem>>, vector<1x8x1024xf32>
    %67 = vector.shape_cast %66 : vector<1x8x1024xf32> to vector<8x1024xf32>
    %c3_42 = arith.constant 3 : index
    %c0_43 = arith.constant 0 : index
    %c0_44 = arith.constant 0 : index
    %68 = vector.load %arg6[%c3_42, %c0_43, %c0_44] : memref<4x8x1024xf32, #tpu.memory_space<vmem>>, vector<1x8x1024xf32>
    %69 = vector.shape_cast %68 : vector<1x8x1024xf32> to vector<8x1024xf32>
    %70 = vector.broadcast %63 : vector<1x1024xf32> to vector<8x1024xf32>
    %71 = arith.mulf %70, %67 : vector<8x1024xf32>
    %72 = vector.broadcast %65 : vector<1x1024xf32> to vector<8x1024xf32>
    %73 = arith.mulf %72, %69 : vector<8x1024xf32>
    %74 = arith.subf %71, %73 : vector<8x1024xf32>
    %75 = arith.addf %55, %74 : vector<8x1024xf32>
    %76 = vector.broadcast %63 : vector<1x1024xf32> to vector<8x1024xf32>
    %77 = arith.mulf %76, %69 : vector<8x1024xf32>
    %78 = vector.broadcast %65 : vector<1x1024xf32> to vector<8x1024xf32>
    %79 = arith.mulf %78, %67 : vector<8x1024xf32>
    %80 = arith.addf %77, %79 : vector<8x1024xf32>
    %81 = arith.addf %61, %80 : vector<8x1024xf32>
    %c0_45 = arith.constant 0 : index
    %c0_46 = arith.constant 0 : index
    %82 = vector.load %arg7[%c0_45, %c0_46] : memref<1x1024xf32, #tpu.memory_space<vmem>>, vector<1x1024xf32>
    %83 = vector.broadcast %82 : vector<1x1024xf32> to vector<8x1024xf32>
    %84 = arith.mulf %75, %83 : vector<8x1024xf32>
    %c0_47 = arith.constant 0 : index
    %c0_48 = arith.constant 0 : index
    %c0_49 = arith.constant 0 : index
    %85 = vector.load %arg8[%c0_47, %c0_48, %c0_49] : memref<1x8x1024xf32, #tpu.memory_space<vmem>>, vector<1x8x1024xf32>
    %86 = vector.shape_cast %85 : vector<1x8x1024xf32> to vector<8x1024xf32>
    %87 = vector.shape_cast %84 : vector<8x1024xf32> to vector<1x8x1024xf32>
    tpu.vector_store %arg8[%c0_47, %c0_48, %c0_49], %87 {strides = array<i32>} : memref<1x8x1024xf32, #tpu.memory_space<vmem>>, vector<1x8x1024xf32>,
    %88 = vector.broadcast %82 : vector<1x1024xf32> to vector<8x1024xf32>
    %89 = arith.mulf %81, %88 : vector<8x1024xf32>
    %c0_50 = arith.constant 0 : index
    %c0_51 = arith.constant 0 : index
    %c0_52 = arith.constant 0 : index
    %90 = vector.load %arg9[%c0_50, %c0_51, %c0_52] : memref<1x8x1024xf32, #tpu.memory_space<vmem>>, vector<1x8x1024xf32>
    %91 = vector.shape_cast %90 : vector<1x8x1024xf32> to vector<8x1024xf32>
    %92 = vector.shape_cast %89 : vector<8x1024xf32> to vector<1x8x1024xf32>
    tpu.vector_store %arg9[%c0_50, %c0_51, %c0_52], %92 {strides = array<i32>} : memref<1x8x1024xf32, #tpu.memory_space<vmem>>, vector<1x8x1024xf32>,
    return
  }
  func.func @transform_0(%arg0: i32, %arg1: i32, %arg2: i32) -> (i32, i32, i32) {
    %c0_i32 = arith.constant 0 : i32
    %c0_i32_0 = arith.constant 0 : i32
    return %arg2, %c0_i32, %arg1 : i32, i32, i32
  }
  func.func @transform_1(%arg0: i32, %arg1: i32, %arg2: i32) -> (i32, i32, i32) {
    %c0_i32 = arith.constant 0 : i32
    %c0_i32_0 = arith.constant 0 : i32
    return %arg2, %c0_i32, %arg1 : i32, i32, i32
  }
  func.func @transform_2(%arg0: i32, %arg1: i32, %arg2: i32) -> (i32, i32, i32) {
    %c0_i32 = arith.constant 0 : i32
    %c0_i32_0 = arith.constant 0 : i32
    return %c0_i32, %arg0, %arg1 : i32, i32, i32
  }
  func.func @transform_3(%arg0: i32, %arg1: i32, %arg2: i32) -> (i32, i32, i32) {
    %c0_i32 = arith.constant 0 : i32
    %c0_i32_0 = arith.constant 0 : i32
    return %c0_i32, %arg0, %arg1 : i32, i32, i32
  }
  func.func @transform_4(%arg0: i32, %arg1: i32, %arg2: i32) -> (i32, i32) {
    %c0_i32 = arith.constant 0 : i32
    %c0_i32_0 = arith.constant 0 : i32
    return %c0_i32, %arg1 : i32, i32
  }
  func.func @transform_5(%arg0: i32, %arg1: i32, %arg2: i32) -> (i32, i32, i32) {
    %c0_i32 = arith.constant 0 : i32
    return %arg2, %arg0, %arg1 : i32, i32, i32
  }
  func.func @transform_6(%arg0: i32, %arg1: i32, %arg2: i32) -> (i32, i32, i32) {
    %c0_i32 = arith.constant 0 : i32
    return %arg2, %arg0, %arg1 : i32, i32, i32
  }
}

module attributes {stable_mosaic.version = 11 : i64} {
  func.func @kernel(%arg0: i32, %arg1: i32, %arg2: memref<2xf32, #tpu.memory_space<smem>>, %arg3: memref<1x4x1024xf32, #tpu.memory_space<vmem>>, %arg4: memref<1x8x1024xf32, #tpu.memory_space<vmem>>, %arg5: memref<8x4xf32, #tpu.memory_space<vmem>>, %arg6: memref<8x1xf32, #tpu.memory_space<vmem>>, %arg7: memref<1x8x1024xf32, #tpu.memory_space<vmem>>) attributes {dimension_semantics = [#tpu.dimension_semantics<parallel>, #tpu.dimension_semantics<parallel>], iteration_bounds = array<i64: 2, 1>, scalar_prefetch = 0 : i64, scratch_operands = 0 : i64, tpu.core_type = #tpu.core_type<tc>, window_params = [{transform_indices = @transform_0, window_bounds = array<i64: 2>}, {transform_indices = @transform_1, window_bounds = array<i64: 1, 4, 1024>}, {transform_indices = @transform_2, window_bounds = array<i64: 1, 8, 1024>}, {pipeline_mode = #tpu.pipeline_mode<synchronous>, transform_indices = @transform_3, window_bounds = array<i64: 8, 4>}, {pipeline_mode = #tpu.pipeline_mode<synchronous>, transform_indices = @transform_4, window_bounds = array<i64: 8, 1>}, {transform_indices = @transform_5, window_bounds = array<i64: 1, 8, 1024>}]} {
    %c0 = arith.constant 0 : index
    %c0_0 = arith.constant 0 : index
    %0 = vector.load %arg5[%c0, %c0_0] : memref<8x4xf32, #tpu.memory_space<vmem>>, vector<8x1xf32>
    %c0_1 = arith.constant 0 : index
    %c0_2 = arith.constant 0 : index
    %c0_3 = arith.constant 0 : index
    %1 = vector.load %arg3[%c0_1, %c0_2, %c0_3] : memref<1x4x1024xf32, #tpu.memory_space<vmem>>, vector<1x1x1024xf32>
    %2 = vector.shape_cast %1 : vector<1x1x1024xf32> to vector<1x1024xf32>
    %3 = vector.broadcast %0 : vector<8x1xf32> to vector<8x1024xf32>
    %4 = vector.broadcast %2 : vector<1x1024xf32> to vector<8x1024xf32>
    %5 = arith.mulf %3, %4 : vector<8x1024xf32>
    %c0_4 = arith.constant 0 : index
    %c1 = arith.constant 1 : index
    %6 = vector.load %arg5[%c0_4, %c1] : memref<8x4xf32, #tpu.memory_space<vmem>>, vector<8x1xf32>
    %c0_5 = arith.constant 0 : index
    %c1_6 = arith.constant 1 : index
    %c0_7 = arith.constant 0 : index
    %7 = vector.load %arg3[%c0_5, %c1_6, %c0_7] : memref<1x4x1024xf32, #tpu.memory_space<vmem>>, vector<1x1x1024xf32>
    %8 = vector.shape_cast %7 : vector<1x1x1024xf32> to vector<1x1024xf32>
    %9 = vector.broadcast %6 : vector<8x1xf32> to vector<8x1024xf32>
    %10 = vector.broadcast %8 : vector<1x1024xf32> to vector<8x1024xf32>
    %11 = arith.mulf %9, %10 : vector<8x1024xf32>
    %12 = arith.addf %5, %11 : vector<8x1024xf32>
    %c0_8 = arith.constant 0 : index
    %c2 = arith.constant 2 : index
    %13 = vector.load %arg5[%c0_8, %c2] : memref<8x4xf32, #tpu.memory_space<vmem>>, vector<8x1xf32>
    %c0_9 = arith.constant 0 : index
    %c2_10 = arith.constant 2 : index
    %c0_11 = arith.constant 0 : index
    %14 = vector.load %arg3[%c0_9, %c2_10, %c0_11] : memref<1x4x1024xf32, #tpu.memory_space<vmem>>, vector<1x1x1024xf32>
    %15 = vector.shape_cast %14 : vector<1x1x1024xf32> to vector<1x1024xf32>
    %16 = vector.broadcast %13 : vector<8x1xf32> to vector<8x1024xf32>
    %17 = vector.broadcast %15 : vector<1x1024xf32> to vector<8x1024xf32>
    %18 = arith.mulf %16, %17 : vector<8x1024xf32>
    %19 = arith.addf %12, %18 : vector<8x1024xf32>
    %c0_12 = arith.constant 0 : index
    %c3 = arith.constant 3 : index
    %20 = vector.load %arg5[%c0_12, %c3] : memref<8x4xf32, #tpu.memory_space<vmem>>, vector<8x1xf32>
    %c0_13 = arith.constant 0 : index
    %c3_14 = arith.constant 3 : index
    %c0_15 = arith.constant 0 : index
    %21 = vector.load %arg3[%c0_13, %c3_14, %c0_15] : memref<1x4x1024xf32, #tpu.memory_space<vmem>>, vector<1x1x1024xf32>
    %22 = vector.shape_cast %21 : vector<1x1x1024xf32> to vector<1x1024xf32>
    %23 = vector.broadcast %20 : vector<8x1xf32> to vector<8x1024xf32>
    %24 = vector.broadcast %22 : vector<1x1024xf32> to vector<8x1024xf32>
    %25 = arith.mulf %23, %24 : vector<8x1024xf32>
    %26 = arith.addf %19, %25 : vector<8x1024xf32>
    %c0_16 = arith.constant 0 : index
    %c0_17 = arith.constant 0 : index
    %27 = vector.load %arg6[%c0_16, %c0_17] : memref<8x1xf32, #tpu.memory_space<vmem>>, vector<8x1xf32>
    %28 = vector.broadcast %27 : vector<8x1xf32> to vector<8x1024xf32>
    %29 = arith.addf %26, %28 : vector<8x1024xf32>
    %c0_18 = arith.constant 0 : index
    %30 = memref.load %arg2[%c0_18] : memref<2xf32, #tpu.memory_space<smem>>
    %c0_19 = arith.constant 0 : index
    %c0_20 = arith.constant 0 : index
    %c0_21 = arith.constant 0 : index
    %31 = vector.load %arg4[%c0_19, %c0_20, %c0_21] : memref<1x8x1024xf32, #tpu.memory_space<vmem>>, vector<1x8x1024xf32>
    %32 = vector.shape_cast %31 : vector<1x8x1024xf32> to vector<8x1024xf32>
    %33 = vector.broadcast %30 : f32 to vector<8x1024xf32>
    %34 = arith.mulf %33, %32 : vector<8x1024xf32>
    %c1_22 = arith.constant 1 : index
    %35 = memref.load %arg2[%c1_22] : memref<2xf32, #tpu.memory_space<smem>>
    %36 = vector.broadcast %35 : f32 to vector<8x1024xf32>
    %37 = arith.mulf %36, %29 : vector<8x1024xf32>
    %38 = arith.addf %34, %37 : vector<8x1024xf32>
    %c0_23 = arith.constant 0 : index
    %c0_24 = arith.constant 0 : index
    %c0_25 = arith.constant 0 : index
    %39 = vector.load %arg7[%c0_23, %c0_24, %c0_25] : memref<1x8x1024xf32, #tpu.memory_space<vmem>>, vector<1x8x1024xf32>
    %40 = vector.shape_cast %39 : vector<1x8x1024xf32> to vector<8x1024xf32>
    %41 = vector.shape_cast %38 : vector<8x1024xf32> to vector<1x8x1024xf32>
    tpu.vector_store %arg7[%c0_23, %c0_24, %c0_25], %41 {strides = array<i32>} : memref<1x8x1024xf32, #tpu.memory_space<vmem>>, vector<1x8x1024xf32>,
    return
  }
  func.func @transform_0(%arg0: i32, %arg1: i32) -> i32 {
    %c0_i32 = arith.constant 0 : i32
    %c0_i32_0 = arith.constant 0 : i32
    return %c0_i32 : i32
  }
  func.func @transform_1(%arg0: i32, %arg1: i32) -> (i32, i32, i32) {
    %c0_i32 = arith.constant 0 : i32
    %c0_i32_0 = arith.constant 0 : i32
    return %arg0, %c0_i32, %arg1 : i32, i32, i32
  }
  func.func @transform_2(%arg0: i32, %arg1: i32) -> (i32, i32, i32) {
    %c0_i32 = arith.constant 0 : i32
    %c0_i32_0 = arith.constant 0 : i32
    return %arg0, %c0_i32, %arg1 : i32, i32, i32
  }
  func.func @transform_3(%arg0: i32, %arg1: i32) -> (i32, i32) {
    %c0_i32 = arith.constant 0 : i32
    %c0_i32_0 = arith.constant 0 : i32
    %c0_i32_1 = arith.constant 0 : i32
    return %c0_i32, %c0_i32_0 : i32, i32
  }
  func.func @transform_4(%arg0: i32, %arg1: i32) -> (i32, i32) {
    %c0_i32 = arith.constant 0 : i32
    %c0_i32_0 = arith.constant 0 : i32
    %c0_i32_1 = arith.constant 0 : i32
    return %c0_i32, %c0_i32_0 : i32, i32
  }
  func.func @transform_5(%arg0: i32, %arg1: i32) -> (i32, i32, i32) {
    %c0_i32 = arith.constant 0 : i32
    %c0_i32_0 = arith.constant 0 : i32
    return %arg0, %c0_i32, %arg1 : i32, i32, i32
  }
}

</mosaic_0001>

<bundles_post_ra>
// kernel: _lambda_.2
= control target key start
LH: loop header
LB: loop body
LE: loop exit
PB: predicated region body
PF: predicated region fallthrough
CT: control target
= control target key end

     0   :  { %s1614_s21 = smov 0   ;;  %s1616_s22 = smov 0   ;;  %s2589_s0 = inlined_call_operand.vmem [shape: f32[2,4,1024], index: 0, kind: input, shape index: {}]   ;;  %s2590_s1 = inlined_call_operand.vmem [shape: f32[2,4,1024], index: 1, kind: input, shape index: {}]   ;;  %s2591_s2 = inlined_call_operand.vmem [shape: f32[4,8,1024], index: 2, kind: input, shape index: {}]   ;;  %s2592_s3 = inlined_call_operand.vmem [shape: f32[4,8,1024], index: 3, kind: input, shape index: {}]   ;;  %s2593_s4 = inlined_call_operand.vmem [shape: f32[1,1024], index: 4, kind: input, shape index: {}]   ;;  %s2594_s5 = inlined_call_operand.vmem [shape: f32[2,8,1024], index: 5, kind: output, shape index: {0}]   ;;  %s2595_s6 = inlined_call_operand.vmem [shape: f32[2,8,1024], index: 6, kind: output, shape index: {1}]  }
   0x1   :  { %s1618_s23 = smov 0  }
   0x2 LB: > { %s29_s24 = sadd.s32 1, %s1573_s22  ;;  %p1462_p0 = scmp.ge.s32.totalorder %s1577_s23, 1  ;;  %s1577_s23 = sphi %s1618_s23, %s17_s23   ;;  %s1573_s22 = sphi %s1616_s22, %s2855_s22   ;;  %s1569_s21 = sphi %s1614_s21, %s2854_s21  }
   0x3   : > { %p30_p1 = scmp.ge.s32.totalorder %s29_s24, 2  ;;  %p310_p2 = scmp.lt.s32.totalorder %s1577_s23, 3 }
   0x5   : > { %s2857_s24 = smov (%p30_p1, %s29_s24), 0  ;;  %p311_p3 = pnand %p1462_p0, %p310_p2 }
   0x7   : > { %314 = sbr.rel (%p311_p3) target bundleno = 123 (0x7b), region = 40 }
   0xe   : > { %p397_p4 = scmp.lt.s32.totalorder %s1569_s21, 1  ;;  %v488_v0 = vlaneseq  ;;  %v1639_v2 = vld [vmem:[%s2593_s4] sm:$0xff]  ;;  %v1708_v19 = vld [vmem:[%s2591_s2 + $0x8] sm:$0xff] }
   0xf   : > { %v1645_v3 = vld [vmem:[%s2591_s2] sm:$0xff]  ;;  %v1749_v33 = vld [vmem:[%s2592_s3 + $0x8] sm:$0xff] }
  0x10   : > { %s2859_s21 = smov (!%p397_p4, %s1569_s21), 1  ;;  %v1634_v1 = vshrl.u32 %v488_v0, 7  ;;  %v1650_v4 = vld [vmem:[%s2592_s3] sm:$0xff]  ;;  %v1787_v48 = vld [vmem:[%s2591_s2 + $0x48] sm:$0xff] }
  0x11   : > { %s1527_s27 = sshll.u32 %s2859_s21, 5  ;;  %v1656_v6 = vld [vmem:[%s2591_s2 + $0x40] sm:$0xff]  ;;  %v1794_v52 = vld [vmem:[%s2592_s3 + $0x48] sm:$0xff]  ;;  %s1529_s30 = sshll.u32 %s2859_s21, 6 }
  0x12   : > { %v490_v5 = vsub.s32 0, %v1634_v1  ;;  %v1659_v7 = vsub.s32 1, %v1634_v1  ;;  %s404_s12 = scalar_lea.vmem %s2589_s0, %s1527_s27  ;;  %s414_s15 = scalar_lea.vmem %s2590_s1, %s1527_s27  ;;  %v1670_v8 = vld [vmem:[%s2592_s3 + $0x40] sm:$0xff]  ;;  %v1683_v11 = vsub.s32 2, %v1634_v1  ;;  %v1686_v12 = vsub.s32 3, %v1634_v1  ;;  %v1803_v54 = vld [vmem:[%s2591_s2 + $0x88] sm:$0xff] }
  0x13   : > { %v1675_v9 = vld [vmem:[%s2591_s2 + $0x80] sm:$0xff]  ;;  %v1689_v13 = vsub.s32 4, %v1634_v1  ;;  %2684 = vst [vmem:[#allocation4_spill] sm:$0xff] %v1803_v54  ;;  %v1808_v55 = vld [vmem:[%s2592_s3 + $0x88] sm:$0xff]  ;;  %s2472_s13 = scalar_lea.vmem %s2595_s6, %s1529_s30 }
  0x14   : > { %v1680_v10 = vld [vmem:[%s2592_s3 + $0x80] sm:$0xff]  ;;  %v1703_v18 = vrot.slane %v1639_v2, %v490_v5  ;;  %v1712_v20 = vrot.slane %v1639_v2, %v1659_v7  ;;  %v1825_v60 = vld [vmem:[%s2591_s2 + $0xc8] sm:$0xff] }
  0x15   : > { %v1691_v14 = vld [vmem:[%s404_s12] ss:$4 sm:$0xff]  ;;  %v1695_v16 = vld [vmem:[%s404_s12 + $0x1] ss:$4 sm:$0xff]  ;;  %v1725_v25 = vld [vmem:[%s404_s12 + $0x2] ss:$4 sm:$0xff] }
  0x16   : > { %v1693_v15 = vld [vmem:[%s414_s15] ss:$4 sm:$0xff]  ;;  %2682 = vst [vmem:[#allocation2_spill] sm:$0xff] %v1703_v18  ;;  %2683 = vst [vmem:[#allocation3_spill] sm:$0xff] %v1712_v20  ;;  %v1715_v21 = vrot.slane %v1691_v14, %v490_v5  ;;  %v1720_v23 = vld [vmem:[%s414_s15 + $0x1] ss:$4 sm:$0xff]  ;;  %v1723_v24 = vrot.slane %v1695_v16, %v490_v5  ;;  %v1731_v27 = vrot.slane %v1691_v14, %v1659_v7 }
  0x17   : > { %v1700_v17 = vld [vmem:[%s2591_s2 + $0xc0] sm:$0xff]  ;;  %v1718_v22 = vrot.slane %v1693_v15, %v490_v5  ;;  %v1734_v28 = vrot.slane %v1720_v23, %v490_v5  ;;  %v1737_v29 = vrot.slane %v1725_v25, %v490_v5  ;;  %v1753_v34 = vrot.slane %v1693_v15, %v1659_v7  ;;  %2685 = vst [vmem:[#allocation5_spill] sm:$0xff] %v1825_v60  ;;  %v1832_v0 = vld [vmem:[%s2592_s3 + $0xc8] sm:$0xff] }
  0x18   : > { %v1727_v26 = vld [vmem:[%s414_s15 + $0x2] ss:$4 sm:$0xff]  ;;  %v1742_v31 = vld [vmem:[%s404_s12 + $0x3] ss:$4 sm:$0xff]  ;;  %v528_v35 = vmul.f32 %v1715_v21, %v1645_v3  ;;  %v696_v37 = vmul.f32 %v1656_v6, %v1723_v24  ;;  %v529_v46 = vmul.f32 %v1731_v27, %v1708_v19  ;;  %v1798_v53 = vrot.slane %v1695_v16, %v1659_v7 }
  0x19   : > { %v1740_v30 = vrot.slane %v1727_v26, %v490_v5  ;;  %v1744_v32 = vld [vmem:[%s414_s15 + $0x3] ss:$4 sm:$0xff]  ;;  %v577_v36 = vmul.f32 %v1718_v22, %v1650_v4  ;;  %v1767_v39 = vrot.slane %v1742_v31, %v490_v5  ;;  %v745_v40 = vmul.f32 %v1670_v8, %v1734_v28  ;;  %s1903_s15 = scalar_lea.vmem %s2594_s5, %s1529_s30 }
  0x1a   : > { %v1764_v38 = vld [vmem:[%s2592_s3 + $0xc0] sm:$0xff]  ;;  %v864_v41 = vmul.f32 %v1675_v9, %v1737_v29  ;;  %v1776_v43 = vrot.slane %v1744_v32, %v490_v5  ;;  %v578_v47 = vmul.f32 %v1753_v34, %v1749_v33  ;;  %v1812_v57 = vrot.slane %v1720_v23, %v1659_v7 }
  0x1b   : > { %v913_v42 = vmul.f32 %v1680_v10, %v1740_v30  ;;  %v585_v44 = vsub.f32 %v528_v35, %v577_v36  ;;  %v1032_v45 = vmul.f32 %v1700_v17, %v1767_v39  ;;  %v753_v49 = vsub.f32 %v696_v37, %v745_v40 }
  0x1c   : > { %v1081_v51 = vmul.f32 %v1764_v38, %v1776_v43  ;;  %v586_v56 = vsub.f32 %v529_v46, %v578_v47  ;;  %v1816_v58 = vrot.slane %v1725_v25, %v1659_v7  ;;  %v1820_v59 = vrot.slane %v1727_v26, %v1659_v7  ;;  %v1872_v47 = vld [vmem:[%s2591_s2 + $0x50] sm:$0xff] }
  0x1d   : > { %v921_v50 = vsub.f32 %v864_v41, %v913_v42  ;;  %v761_v61 = vadd.f32 %v753_v49, %v585_v44  ;;  %v697_v63 = vmul.f32 %v1787_v48, %v1798_v53  ;;  %v1836_v5 = vrot.slane %v1742_v31, %v1659_v7  ;;  %v1851_v41 = vld [vmem:[%s2591_s2 + $0x10] sm:$0xff]  ;;  %2691 = vst [vmem:[#allocation11_spill] sm:$0xff] %v1872_v47 }
  0x1e   : > { %v1089_v62 = vsub.f32 %v1032_v45, %v1081_v51  ;;  %v746_v35 = vmul.f32 %v1794_v52, %v1812_v57  ;;  %v865_v36 = vmul.f32 %v1803_v54, %v1816_v58  ;;  %v914_v37 = vmul.f32 %v1808_v55, %v1820_v59  ;;  %2687 = vst [vmem:[#allocation7_spill] sm:$0xff] %v1851_v41  ;;  %v1856_v42 = vld [vmem:[%s2592_s3 + $0x10] sm:$0xff] }
  0x1f   : > { %2686 = vst [vmem:[#allocation6_spill] sm:$0xff] %v1836_v5  ;;  %v1846_v40 = vrot.slane %v1744_v32, %v1659_v7  ;;  %2688 = vst [vmem:[#allocation8_spill] sm:$0xff] %v1856_v42  ;;  %v929_v44 = vadd.f32 %v921_v50, %v761_v61  ;;  %v1033_v45 = vmul.f32 %v1825_v60, %v1836_v5  ;;  %v1879_v61 = vld [vmem:[%s2592_s3 + $0x50] sm:$0xff] }
  0x20   : > { %v1863_v7 = vrot.slane %v1691_v14, %v1683_v11  ;;  %v1867_v46 = vrot.slane %v1693_v15, %v1683_v11  ;;  %v754_v49 = vsub.f32 %v697_v63, %v746_v35  ;;  %v922_v51 = vsub.f32 %v865_v36, %v914_v37  ;;  %2692 = vst [vmem:[#allocation12_spill] sm:$0xff] %v1879_v61  ;;  %v1896_v36 = vld [vmem:[%s2591_s2 + $0x90] sm:$0xff] }
  0x21   : > { %v1082_v50 = vmul.f32 %v1832_v0, %v1846_v40  ;;  %v1883_v60 = vrot.slane %v1695_v16, %v1683_v11  ;;  %v1097_v5 = vadd.f32 %v1089_v62, %v929_v44  ;;  %v1891_v35 = vrot.slane %v1720_v23, %v1683_v11  ;;  %2695 = vst [vmem:[#allocation15_spill] sm:$0xff] %v1896_v36 }
  0x22   : > { %2689 = vst [vmem:[#allocation9_spill] sm:$0xff] %v1863_v7  ;;  %2690 = vst [vmem:[#allocation10_spill] sm:$0xff] %v1867_v46  ;;  %v530_v54 = vmul.f32 %v1863_v7, %v1851_v41  ;;  %v579_v63 = vmul.f32 %v1867_v46, %v1856_v42  ;;  %v762_v62 = vadd.f32 %v754_v49, %v586_v56  ;;  %v1910_v46 = vld [vmem:[%s2592_s3 + $0x90] sm:$0xff] }
  0x23   : > { %2693 = vst [vmem:[#allocation13_spill] sm:$0xff] %v1883_v60  ;;  %2694 = vst [vmem:[#allocation14_spill] sm:$0xff] %v1891_v35  ;;  %v1090_v37 = vsub.f32 %v1033_v45, %v1082_v50  ;;  %v698_v44 = vmul.f32 %v1872_v47, %v1883_v60  ;;  %v1914_v41 = vrot.slane %v1725_v25, %v1683_v11  ;;  %v1926_v49 = vld [vmem:[%s2591_s2 + $0xd0] sm:$0xff] }
  0x24   : > { %2696 = vst [vmem:[#allocation16_spill] sm:$0xff] %v1910_v46  ;;  %v1179_v7 = vmul.f32 %v1703_v18, %v1097_v5  ;;  %v587_v42 = vsub.f32 %v530_v54, %v579_v63  ;;  %v747_v56 = vmul.f32 %v1879_v61, %v1891_v35  ;;  %v1921_v45 = vrot.slane %v1727_v26, %v1683_v11  ;;  %v1931_v50 = vld [vmem:[%s2592_s3 + $0xd0] sm:$0xff]  ;;  %v1946_v18 = vld [vmem:[%s2591_s2 + $0x18] sm:$0xff] }
  0x25   : > { %2697 = vst [vmem:[#allocation17_spill] sm:$0xff] %v1914_v41  ;;  %2699 = vst [vmem:[#allocation19_spill] sm:$0xff] %v1926_v49  ;;  %v930_v47 = vadd.f32 %v922_v51, %v762_v62  ;;  %v866_v54 = vmul.f32 %v1896_v36, %v1914_v41  ;;  %v1937_v5 = vrot.slane %v1742_v31, %v1683_v11  ;;  %v1958_v36 = vld [vmem:[%s2592_s3 + $0x18] sm:$0xff] }
  0x26   : > { %2698 = vst [vmem:[#allocation18_spill] sm:$0xff] %v1921_v45  ;;  %2700 = vst [vmem:[#allocation20_spill] sm:$0xff] %v1931_v50  ;;  %v1941_v63 = vrot.slane %v1744_v32, %v1683_v11  ;;  %v755_v35 = vsub.f32 %v698_v44, %v747_v56  ;;  %v915_v51 = vmul.f32 %v1910_v46, %v1921_v45  ;;  %v1975_v56 = vld [vmem:[%s2591_s2 + $0x58] sm:$0xff] }
  0x27   : > { %2701 = vst [vmem:[#allocation21_spill] sm:$0xff] %v1937_v5  ;;  %2703 = vst [vmem:[#allocation23_spill] sm:$0xff] %v1946_v18  ;;  %v1953_v62 = vrot.slane %v1639_v2, %v1683_v11  ;;  %v1962_v41 = vrot.slane %v1691_v14, %v1686_v12  ;;  %v1098_v61 = vadd.f32 %v1090_v37, %v930_v47  ;;  %v1982_v37 = vld [vmem:[%s2592_s3 + $0x58] sm:$0xff] }
  0x28   : > { %2702 = vst [vmem:[#allocation22_spill] sm:$0xff] %v1941_v63  ;;  %1187 = vst [vmem:[%s1903_s15] sm:$0xff] %v1179_v7  ;;  %v1034_v7 = vmul.f32 %v1926_v49, %v1937_v5  ;;  %v1083_v44 = vmul.f32 %v1931_v50, %v1941_v63  ;;  %v1970_v11 = vrot.slane %v1693_v15, %v1686_v12 }
  0x29   : > { %2704 = vst [vmem:[#allocation24_spill] sm:$0xff] %v1953_v62  ;;  %2705 = vst [vmem:[#allocation25_spill] sm:$0xff] %v1958_v36  ;;  %v763_v45 = vadd.f32 %v755_v35, %v587_v42  ;;  %v923_v46 = vsub.f32 %v866_v54, %v915_v51  ;;  %v531_v47 = vmul.f32 %v1962_v41, %v1946_v18  ;;  %v1998_v54 = vld [vmem:[%s2591_s2 + $0x98] sm:$0xff] }
  0x2a   : > { %2706 = vst [vmem:[#allocation26_spill] sm:$0xff] %v1962_v41  ;;  %2707 = vst [vmem:[#allocation27_spill] sm:$0xff] %v1970_v11  ;;  %v1986_v49 = vrot.slane %v1695_v16, %v1686_v12  ;;  %v1180_v63 = vmul.f32 %v1712_v20, %v1098_v61  ;;  %v1091_v50 = vsub.f32 %v1034_v7, %v1083_v44  ;;  %v2003_v51 = vld [vmem:[%s2592_s3 + $0x98] sm:$0xff] }
  0x2b   : > { %2708 = vst [vmem:[#allocation28_spill] sm:$0xff] %v1975_v56  ;;  %2709 = vst [vmem:[#allocation29_spill] sm:$0xff] %v1982_v37  ;;  %v580_v42 = vmul.f32 %v1970_v11, %v1958_v36  ;;  %v1993_v35 = vrot.slane %v1720_v23, %v1686_v12  ;;  %v931_v18 = vadd.f32 %v923_v46, %v763_v45  ;;  %v2018_v20 = vld [vmem:[%s2591_s2 + $0xd8] sm:$0xff] }
  0x2c   : > { %2710 = vst [vmem:[#allocation30_spill] sm:$0xff] %v1986_v49  ;;  %2712 = vst [vmem:[#allocation32_spill] sm:$0xff] %v1998_v54  ;;  %v699_v61 = vmul.f32 %v1975_v56, %v1986_v49  ;;  %v2009_v7 = vrot.slane %v1725_v25, %v1686_v12  ;;  %v2013_v44 = vrot.slane %v1727_v26, %v1686_v12  ;;  %v2023_v46 = vld [vmem:[%s2592_s3 + $0xd8] sm:$0xff] }
  0x2d   : > { %2711 = vst [vmem:[#allocation31_spill] sm:$0xff] %v1993_v35  ;;  %2713 = vst [vmem:[#allocation33_spill] sm:$0xff] %v2003_v51  ;;  %v588_v45 = vsub.f32 %v531_v47, %v580_v42  ;;  %v748_v56 = vmul.f32 %v1982_v37, %v1993_v35  ;;  %v2030_v49 = vrot.slane %v1742_v31, %v1686_v12  ;;  %v2047_v47 = vld [vmem:[%s2591_s2 + $0x20] sm:$0xff] }
  0x2e   : > { %2714 = vst [vmem:[#allocation34_spill] sm:$0xff] %v2009_v7  ;;  %2715 = vst [vmem:[#allocation35_spill] sm:$0xff] %v2013_v44  ;;  %v2034_v11 = vrot.slane %v1744_v32, %v1686_v12  ;;  %v1099_v41 = vadd.f32 %v1091_v50, %v931_v18  ;;  %v867_v36 = vmul.f32 %v1998_v54, %v2009_v7  ;;  %v2056_v50 = vld [vmem:[%s2592_s3 + $0x20] sm:$0xff] }
  0x2f   : > { %2716 = vst [vmem:[#allocation36_spill] sm:$0xff] %v2018_v20  ;;  %2717 = vst [vmem:[#allocation37_spill] sm:$0xff] %v2023_v46  ;;  %v916_v5 = vmul.f32 %v2003_v51, %v2013_v44  ;;  %v756_v42 = vsub.f32 %v699_v61, %v748_v56  ;;  %v1035_v35 = vmul.f32 %v2018_v20, %v2030_v49  ;;  %v2065_v56 = vld [vmem:[%s2591_s2 + $0x60] sm:$0xff] }
  0x30   : > { %1188 = vst [vmem:[%s1903_s15 + $0x8] sm:$0xff] %v1180_v63  ;;  %2718 = vst [vmem:[#allocation38_spill] sm:$0xff] %v2030_v49  ;;  %v2042_v63 = vrot.slane %v1639_v2, %v1686_v12  ;;  %v1084_v18 = vmul.f32 %v2023_v46, %v2034_v11  ;;  %v2060_v12 = vrot.slane %v1691_v14, %v1689_v13  ;;  %v2075_v46 = vld [vmem:[%s2592_s3 + $0x60] sm:$0xff] }
  0x31   : > { %2719 = vst [vmem:[#allocation39_spill] sm:$0xff] %v2034_v11  ;;  %2721 = vst [vmem:[#allocation41_spill] sm:$0xff] %v2047_v47  ;;  %v1181_v61 = vmul.f32 %v1953_v62, %v1099_v41  ;;  %v924_v20 = vsub.f32 %v867_v36, %v916_v5  ;;  %v2070_v11 = vrot.slane %v1693_v15, %v1689_v13  ;;  %v2090_v36 = vld [vmem:[%s2591_s2 + $0xa0] sm:$0xff] }
  0x32   : > { %2720 = vst [vmem:[#allocation40_spill] sm:$0xff] %v2042_v63  ;;  %2722 = vst [vmem:[#allocation42_spill] sm:$0xff] %v2056_v50  ;;  %v2079_v49 = vrot.slane %v1695_v16, %v1689_v13  ;;  %v764_v54 = vadd.f32 %v756_v42, %v588_v45  ;;  %v1092_v44 = vsub.f32 %v1035_v35, %v1084_v18  ;;  %v2095_v5 = vld [vmem:[%s2592_s3 + $0xa0] sm:$0xff] }
  0x33   : > { %2723 = vst [vmem:[#allocation43_spill] sm:$0xff] %v2060_v12  ;;  %2724 = vst [vmem:[#allocation44_spill] sm:$0xff] %v2065_v56  ;;  %v532_v51 = vmul.f32 %v2060_v12, %v2047_v47  ;;  %v2085_v41 = vrot.slane %v1720_v23, %v1689_v13  ;;  %v581_v35 = vmul.f32 %v2070_v11, %v2056_v50  ;;  %v2113_v62 = vld [vmem:[%s2591_s2 + $0xe0] sm:$0xff] }
  0x34   : > { %2725 = vst [vmem:[#allocation45_spill] sm:$0xff] %v2070_v11  ;;  %2726 = vst [vmem:[#allocation46_spill] sm:$0xff] %v2075_v46  ;;  %v700_v45 = vmul.f32 %v2065_v56, %v2079_v49  ;;  %v2104_v42 = vrot.slane %v1725_v25, %v1689_v13  ;;  %v2108_v18 = vrot.slane %v1727_v26, %v1689_v13 }
  0x35   : > { %2727 = vst [vmem:[#allocation47_spill] sm:$0xff] %v2079_v49  ;;  %2728 = vst [vmem:[#allocation48_spill] sm:$0xff] %v2085_v41  ;;  %v932_v11 = vadd.f32 %v924_v20, %v764_v54  ;;  %v749_v56 = vmul.f32 %v2075_v46, %v2085_v41  ;;  %v2124_v49 = vrot.slane %v1742_v31, %v1689_v13 }
  0x36   : > { %2729 = vst [vmem:[#allocation49_spill] sm:$0xff] %v2090_v36  ;;  %2730 = vst [vmem:[#allocation50_spill] sm:$0xff] %v2095_v5  ;;  %v2128_v47 = vrot.slane %v1744_v32, %v1689_v13  ;;  %v589_v12 = vsub.f32 %v532_v51, %v581_v35  ;;  %v868_v50 = vmul.f32 %v2090_v36, %v2104_v42  ;;  %v2145_v51 = vld [vmem:[%s2591_s2 + $0x28] sm:$0xff]  ;;  %v510_v35 = vsub.s32 5, %v1634_v1 }
  0x37   : > { %1189 = vst [vmem:[%s1903_s15 + $0x10] sm:$0xff] %v1181_v61  ;;  %2731 = vst [vmem:[#allocation51_spill] sm:$0xff] %v2104_v42  ;;  %v2118_v61 = vld [vmem:[%s2592_s3 + $0xe0] sm:$0xff]  ;;  %v917_v7 = vmul.f32 %v2095_v5, %v2108_v18  ;;  %v2136_v20 = vrot.slane %v1639_v2, %v1689_v13  ;;  %v1100_v54 = vadd.f32 %v1092_v44, %v932_v11  ;;  %v2149_v36 = vsub.s32 6, %v1634_v1 }
  0x38   : > { %2732 = vst [vmem:[#allocation52_spill] sm:$0xff] %v2108_v18  ;;  %2733 = vst [vmem:[#allocation53_spill] sm:$0xff] %v2113_v62  ;;  %v757_v41 = vsub.f32 %v700_v45, %v749_v56  ;;  %v1036_v46 = vmul.f32 %v2113_v62, %v2124_v49  ;;  %v1085_v37 = vmul.f32 %v2118_v61, %v2128_v47  ;;  %v2152_v13 = vsub.s32 7, %v1634_v1  ;;  %v2168_v45 = vld [vmem:[%s2592_s3 + $0x68] sm:$0xff] }
  0x39   : > { %2734 = vst [vmem:[#allocation54_spill] sm:$0xff] %v2118_v61  ;;  %2735 = vst [vmem:[#allocation55_spill] sm:$0xff] %v2124_v49  ;;  %v925_v60 = vsub.f32 %v868_v50, %v917_v7  ;;  %v1182_v11 = vmul.f32 %v2042_v63, %v1100_v54  ;;  %v2158_v7 = vld [vmem:[%s2592_s3 + $0x28] sm:$0xff]  ;;  %v2172_v1 = vmul.f32 %v1715_v21, %v1650_v4 }
  0x3a   : > { %2736 = vst [vmem:[#allocation56_spill] sm:$0xff] %v2128_v47  ;;  %2737 = vst [vmem:[#allocation57_spill] sm:$0xff] %v2136_v20  ;;  %v765_v44 = vadd.f32 %v757_v41, %v589_v12  ;;  %v1093_v56 = vsub.f32 %v1036_v46, %v1085_v37  ;;  %v2163_v50 = vld [vmem:[%s2591_s2 + $0x68] sm:$0xff]  ;;  %v2175_v37 = vrot.slane %v1691_v14, %v510_v35 }
  0x3b   : > { %2738 = vst [vmem:[#allocation58_spill] sm:$0xff] %v2145_v51  ;;  %2739 = vst [vmem:[#allocation59_spill] sm:$0xff] %v2163_v50  ;;  %v2178_v46 = vrot.slane %v1693_v15, %v510_v35  ;;  %v2181_v12 = vrot.slane %v1695_v16, %v510_v35  ;;  %v2184_v41 = vrot.slane %v1720_v23, %v510_v35  ;;  %v2189_v54 = vld [vmem:[%s2591_s2 + $0xa8] sm:$0xff] }
  0x3c   : > { %2740 = vst [vmem:[#allocation60_spill] sm:$0xff] %v2175_v37  ;;  %2744 = vst [vmem:[#allocation64_spill] sm:$0xff] %v2189_v54  ;;  %v2194_v4 = vld [vmem:[%s2592_s3 + $0xa8] sm:$0xff]  ;;  %v933_v63 = vadd.f32 %v925_v60, %v765_v44  ;;  %v2203_v62 = vrot.slane %v1725_v25, %v510_v35  ;;  %v2206_v47 = vrot.slane %v1727_v26, %v510_v35 }
  0x3d   : > { %2741 = vst [vmem:[#allocation61_spill] sm:$0xff] %v2178_v46  ;;  %2742 = vst [vmem:[#allocation62_spill] sm:$0xff] %v2181_v12  ;;  %v2199_v21 = vld [vmem:[%s2591_s2 + $0xe8] sm:$0xff]  ;;  %v2209_v61 = vrot.slane %v1742_v31, %v510_v35  ;;  %v533_v49 = vmul.f32 %v2175_v37, %v2145_v51  ;;  %v582_v18 = vmul.f32 %v2178_v46, %v2158_v7 }
  0x3e   : > { %2743 = vst [vmem:[#allocation63_spill] sm:$0xff] %v2184_v41  ;;  %2745 = vst [vmem:[#allocation65_spill] sm:$0xff] %v2194_v4  ;;  %v701_v5 = vmul.f32 %v2163_v50, %v2181_v12  ;;  %v750_v60 = vmul.f32 %v2168_v45, %v2184_v41  ;;  %v869_v44 = vmul.f32 %v2189_v54, %v2203_v62  ;;  %v2226_v51 = vld [vmem:[%s2592_s3 + $0xe8] sm:$0xff]  ;;  %v2244_v54 = vld [vmem:[%s2592_s3 + $0x30] sm:$0xff] }
  0x3f   : > { %2746 = vst [vmem:[#allocation66_spill] sm:$0xff] %v2199_v21  ;;  %1190 = vst [vmem:[%s1903_s15 + $0x18] sm:$0xff] %v1182_v11  ;;  %v1101_v11 = vadd.f32 %v1093_v56, %v933_v63  ;;  %v918_v42 = vmul.f32 %v2194_v4, %v2206_v47  ;;  %v1037_v46 = vmul.f32 %v2199_v21, %v2209_v61  ;;  %v2239_v56 = vld [vmem:[%s2591_s2 + $0x30] sm:$0xff] }
  0x40   : > { %2747 = vst [vmem:[#allocation67_spill] sm:$0xff] %v2203_v62  ;;  %2748 = vst [vmem:[#allocation68_spill] sm:$0xff] %v2206_v47  ;;  %v590_v37 = vsub.f32 %v533_v49, %v582_v18  ;;  %v758_v50 = vsub.f32 %v701_v5, %v750_v60  ;;  %v2231_v12 = vrot.slane %v1744_v32, %v510_v35  ;;  %v2258_v60 = vld [vmem:[%s2591_s2 + $0x70] sm:$0xff] }
  0x41   : > { %2749 = vst [vmem:[#allocation69_spill] sm:$0xff] %v2209_v61  ;;  %2750 = vst [vmem:[#allocation70_spill] sm:$0xff] %v2226_v51  ;;  %v2234_v63 = vrot.slane %v1639_v2, %v510_v35  ;;  %v1183_v49 = vmul.f32 %v2136_v20, %v1101_v11  ;;  %v926_v5 = vsub.f32 %v869_v44, %v918_v42  ;;  %v2263_v21 = vld [vmem:[%s2592_s3 + $0x70] sm:$0xff] }
  0x42   : > { %2751 = vst [vmem:[#allocation71_spill] sm:$0xff] %v2231_v12  ;;  %2753 = vst [vmem:[#allocation73_spill] sm:$0xff] %v2239_v56  ;;  %v2249_v18 = vrot.slane %v1691_v14, %v2149_v36  ;;  %v2253_v35 = vrot.slane %v1693_v15, %v2149_v36  ;;  %v766_v11 = vadd.f32 %v758_v50, %v590_v37  ;;  %v2278_v61 = vld [vmem:[%s2591_s2 + $0xb0] sm:$0xff] }
  0x43   : > { %2752 = vst [vmem:[#allocation72_spill] sm:$0xff] %v2234_v63  ;;  %2754 = vst [vmem:[#allocation74_spill] sm:$0xff] %v2244_v54  ;;  %v1086_v42 = vmul.f32 %v2226_v51, %v2231_v12  ;;  %v2269_v44 = vrot.slane %v1695_v16, %v2149_v36  ;;  %v2273_v20 = vrot.slane %v1720_v23, %v2149_v36  ;;  %v2283_v50 = vld [vmem:[%s2592_s3 + $0xb0] sm:$0xff] }
  0x44   : > { %2755 = vst [vmem:[#allocation75_spill] sm:$0xff] %v2249_v18  ;;  %2756 = vst [vmem:[#allocation76_spill] sm:$0xff] %v2253_v35  ;;  %v534_v37 = vmul.f32 %v2249_v18, %v2239_v56  ;;  %v583_v12 = vmul.f32 %v2253_v35, %v2244_v54  ;;  %v2292_v51 = vrot.slane %v1725_v25, %v2149_v36  ;;  %v2305_v35 = vld [vmem:[%s2591_s2 + $0xf0] sm:$0xff] }
  0x45   : > { %2757 = vst [vmem:[#allocation77_spill] sm:$0xff] %v2278_v61  ;;  %2758 = vst [vmem:[#allocation78_spill] sm:$0xff] %v2283_v50  ;;  %v2296_v47 = vrot.slane %v1727_v26, %v2149_v36  ;;  %v934_v4 = vadd.f32 %v926_v5, %v766_v11  ;;  %v1094_v62 = vsub.f32 %v1037_v46, %v1086_v42  ;;  %v2314_v46 = vld [vmem:[%s2592_s3 + $0xf0] sm:$0xff] }
  0x46   : > { %1191 = vst [vmem:[%s1903_s15 + $0x20] sm:$0xff] %v1183_v49  ;;  %v702_v41 = vmul.f32 %v2258_v60, %v2269_v44  ;;  %v751_v49 = vmul.f32 %v2263_v21, %v2273_v20  ;;  %2760 = vst [vmem:[#allocation80_spill] sm:$0xff] %v2305_v35  ;;  %v591_v56 = vsub.f32 %v534_v37, %v583_v12 }
  0x47   : > { %2759 = vst [vmem:[#allocation79_spill] sm:$0xff] %v2296_v47  ;;  %v870_v18 = vmul.f32 %v2278_v61, %v2292_v51  ;;  %v919_v54 = vmul.f32 %v2283_v50, %v2296_v47  ;;  %2761 = vst [vmem:[#allocation81_spill] sm:$0xff] %v2314_v46  ;;  %v2318_v5 = vrot.slane %v1742_v31, %v2149_v36  ;;  %v2331_v61 = vld [vmem:[%s2591_s2 + $0x38] sm:$0xff] }
  0x48   : > { %v1102_v11 = vadd.f32 %v1094_v62, %v934_v4  ;;  %v759_v42 = vsub.f32 %v702_v41, %v751_v49  ;;  %v2322_v12 = vrot.slane %v1744_v32, %v2149_v36  ;;  %v2326_v37 = vrot.slane %v1639_v2, %v2149_v36  ;;  %2763 = vst [vmem:[#allocation83_spill] sm:$0xff] %v2331_v61  ;;  %v2336_v47 = vld [vmem:[%s2592_s3 + $0x38] sm:$0xff] }
  0x49   : > { %v927_v62 = vsub.f32 %v870_v18, %v919_v54  ;;  %v1038_v41 = vmul.f32 %v2305_v35, %v2318_v5  ;;  %v2342_v4 = vrot.slane %v1691_v14, %v2152_v13  ;;  %v2346_v36 = vrot.slane %v1693_v15, %v2152_v13  ;;  %v2351_v49 = vld [vmem:[%s2591_s2 + $0x78] sm:$0xff] }
  0x4a   : > { %2762 = vst [vmem:[#allocation82_spill] sm:$0xff] %v2322_v12  ;;  %v1184_v50 = vmul.f32 %v2234_v63, %v1102_v11  ;;  %v767_v54 = vadd.f32 %v759_v42, %v591_v56  ;;  %v1087_v18 = vmul.f32 %v2314_v46, %v2322_v12  ;;  %v2359_v14 = vld [vmem:[%s2592_s3 + $0x78] sm:$0xff]  ;;  %v2363_v15 = vrot.slane %v1695_v16, %v2152_v13 }
  0x4b   : > { %2764 = vst [vmem:[#allocation84_spill] sm:$0xff] %v2342_v4  ;;  %2765 = vst [vmem:[#allocation85_spill] sm:$0xff] %v2346_v36  ;;  %v2368_v35 = vld [vmem:[%s2591_s2 + $0xb8] sm:$0xff]  ;;  %v535_v56 = vmul.f32 %v2342_v4, %v2331_v61  ;;  %v584_v11 = vmul.f32 %v2346_v36, %v2336_v47  ;;  %v2376_v42 = vrot.slane %v1720_v23, %v2152_v13 }
  0x4c   : > { %2766 = vst [vmem:[#allocation86_spill] sm:$0xff] %v2368_v35  ;;  %v2381_v16 = vld [vmem:[%s2592_s3 + $0xb8] sm:$0xff]  ;;  %v2385_v63 = vrot.slane %v1725_v25, %v2152_v13  ;;  %1192 = vst [vmem:[%s1903_s15 + $0x28] sm:$0xff] %v1184_v50  ;;  %v935_v12 = vadd.f32 %v927_v62, %v767_v54  ;;  %v1095_v46 = vsub.f32 %v1038_v41, %v1087_v18 }
  0x4d   : > { %v703_v61 = vmul.f32 %v2351_v49, %v2363_v15  ;;  %v2392_v36 = vrot.slane %v1727_v26, %v2152_v13  ;;  %v2397_v23 = vld [vmem:[%s2591_s2 + $0xf8] sm:$0xff]  ;;  %v592_v4 = vsub.f32 %v535_v56, %v584_v11  ;;  %v752_v25 = vmul.f32 %v2359_v14, %v2376_v42 }
  0x4e   : > { %v871_v50 = vmul.f32 %v2368_v35, %v2385_v63  ;;  %v2406_v62 = vld [vmem:[%s2592_s3 + $0xf8] sm:$0xff]  ;;  %v2410_v26 = vrot.slane %v1742_v31, %v2152_v13  ;;  %v1103_v41 = vadd.f32 %v1095_v46, %v935_v12  ;;  %v2416_v18 = vrot.slane %v1744_v32, %v2152_v13 }
  0x4f   : > { %2767 = vst [vmem:[#allocation87_spill] sm:$0xff] %v2392_v36  ;;  %v920_v54 = vmul.f32 %v2381_v16, %v2392_v36  ;;  %v2420_v56 = vrot.slane %v1639_v2, %v2152_v13  ;;  %v760_v11 = vsub.f32 %v703_v61, %v752_v25  ;;  %v609_v31 = vmul.f32 %v1718_v22, %v1645_v3 }
  0x50   : > { %v1039_v35 = vmul.f32 %v2397_v23, %v2410_v26  ;;  %v769_v46 = vmul.f32 %v1670_v8, %v1723_v24  ;;  %v1185_v12 = vmul.f32 %v2326_v37, %v1103_v41  ;;  %v1088_v32 = vmul.f32 %v2406_v62, %v2416_v18 }
  0x51   : > { %v928_v36 = vsub.f32 %v871_v50, %v920_v54  ;;  %v777_v2 = vmul.f32 %v1656_v6, %v1734_v28  ;;  %v768_v13 = vadd.f32 %v760_v11, %v592_v4  ;;  %v617_v61 = vadd.f32 %v609_v31, %v2172_v1  ;;  %v2771_v4 = vld [vmem:[#allocation8_spill] sm:$0xff]  ;;  %v2773_v11 = vld [vmem:[#allocation7_spill] sm:$0xff]  ;;  %v2774_v31 = vld [vmem:[#allocation10_spill] sm:$0xff] }
  0x52   : > { %v937_v25 = vmul.f32 %v1680_v10, %v1737_v29  ;;  %v945_v3 = vmul.f32 %v1675_v9, %v1740_v30  ;;  %1193 = vst [vmem:[%s1903_s15 + $0x30] sm:$0xff] %v1185_v12  ;;  %v1096_v8 = vsub.f32 %v1039_v35, %v1088_v32  ;;  %v1105_v24 = vmul.f32 %v1764_v38, %v1767_v39  ;;  %v2775_v12 = vld [vmem:[#allocation13_spill] sm:$0xff]  ;;  %v2776_v32 = vld [vmem:[#allocation12_spill] sm:$0xff] }
  0x53   : > { %v785_v22 = vadd.f32 %v777_v2, %v769_v46  ;;  %v1113_v50 = vmul.f32 %v1700_v17, %v1776_v43  ;;  %v936_v41 = vadd.f32 %v928_v36, %v768_v13  ;;  %v602_v28 = vmul.f32 %v1731_v27, %v1749_v33  ;;  %v2768_v27 = vld [vmem:[#allocation4_spill] sm:$0xff]  ;;  %v2772_v36 = vld [vmem:[#allocation9_spill] sm:$0xff]  ;;  %v2778_v13 = vld [vmem:[#allocation11_spill] sm:$0xff] }
  0x54   : > { %v953_v6 = vadd.f32 %v945_v3, %v937_v25  ;;  %v610_v10 = vmul.f32 %v1753_v34, %v1708_v19  ;;  %v770_v9 = vmul.f32 %v1794_v52, %v1798_v53  ;;  %v778_v30 = vmul.f32 %v1787_v48, %v1812_v57  ;;  %v2769_v34 = vld [vmem:[#allocation6_spill] sm:$0xff]  ;;  %v2770_v52 = vld [vmem:[#allocation5_spill] sm:$0xff]  ;;  %v2780_v3 = vld [vmem:[#allocation16_spill] sm:$0xff] }
  0x55   : > { %v793_v29 = vadd.f32 %v785_v22, %v617_v61  ;;  %v1121_v1 = vadd.f32 %v1113_v50, %v1105_v24  ;;  %v1104_v38 = vadd.f32 %v1096_v8, %v936_v41  ;;  %v938_v17 = vmul.f32 %v1808_v55, %v1816_v58  ;;  %v2779_v25 = vld [vmem:[#allocation17_spill] sm:$0xff]  ;;  %v2781_v22 = vld [vmem:[#allocation18_spill] sm:$0xff]  ;;  %v2782_v24 = vld [vmem:[#allocation15_spill] sm:$0xff] }
  0x56   : > { %v618_v39 = vadd.f32 %v610_v10, %v602_v28  ;;  %v946_v33 = vmul.f32 %v2768_v27, %v1820_v59  ;;  %v786_v19 = vadd.f32 %v778_v30, %v770_v9  ;;  %v1106_v35 = vmul.f32 %v1832_v0, %v2769_v34  ;;  %v2783_v41 = vld [vmem:[#allocation2_spill] sm:$0xff]  ;;  %v2784_v10 = vld [vmem:[#allocation21_spill] sm:$0xff]  ;;  %v2787_v30 = vld [vmem:[#allocation19_spill] sm:$0xff] }
  0x57   : > { %v961_v43 = vadd.f32 %v953_v6, %v793_v29  ;;  %v1114_v53 = vmul.f32 %v2770_v52, %v1846_v40  ;;  %v1186_v48 = vmul.f32 %v2420_v56, %v1104_v38  ;;  %v603_v54 = vmul.f32 %v2772_v36, %v2771_v4  ;;  %v2777_v40 = vld [vmem:[#allocation14_spill] sm:$0xff]  ;;  %v2785_v29 = vld [vmem:[#allocation20_spill] sm:$0xff]  ;;  %v2788_v27 = vld [vmem:[#allocation25_spill] sm:$0xff] }
  0x58   : > { %v954_v57 = vadd.f32 %v946_v33, %v938_v17  ;;  %v611_v55 = vmul.f32 %v2774_v31, %v2773_v11  ;;  %v794_v46 = vadd.f32 %v786_v19, %v618_v39  ;;  %v771_v2 = vmul.f32 %v2776_v32, %v2775_v12  ;;  %v2786_v9 = vld [vmem:[#allocation22_spill] sm:$0xff]  ;;  %v2790_v19 = vld [vmem:[#allocation23_spill] sm:$0xff] }
  0x59   : > { %v1129_v58 = vadd.f32 %v1121_v1, %v961_v43  ;;  %v1122_v59 = vadd.f32 %v1114_v53, %v1106_v35  ;;  %1194 = vst [vmem:[%s1903_s15 + $0x38] sm:$0xff] %v1186_v48  ;;  %v779_v61 = vmul.f32 %v2778_v13, %v2777_v40  ;;  %v939_v8 = vmul.f32 %v2780_v3, %v2779_v25  ;;  %v2789_v33 = vld [vmem:[#allocation26_spill] sm:$0xff]  ;;  %v2791_v34 = vld [vmem:[#allocation27_spill] sm:$0xff]  ;;  %v2802_v3 = vld [vmem:[#allocation37_spill] sm:$0xff] }
  0x5a   : > { %v619_v0 = vadd.f32 %v611_v55, %v603_v54  ;;  %v947_v50 = vmul.f32 %v2782_v24, %v2781_v22  ;;  %v962_v28 = vadd.f32 %v954_v57, %v794_v46  ;;  %v1107_v1 = vmul.f32 %v2785_v29, %v2784_v10  ;;  %v2792_v48 = vld [vmem:[#allocation30_spill] sm:$0xff]  ;;  %v2793_v57 = vld [vmem:[#allocation29_spill] sm:$0xff]  ;;  %v2794_v36 = vld [vmem:[#allocation31_spill] sm:$0xff] }
  0x5b   : > { %v1195_v6 = vmul.f32 %v2783_v41, %v1129_v58  ;;  %v1115_v38 = vmul.f32 %v2787_v30, %v2786_v9  ;;  %v787_v39 = vadd.f32 %v779_v61, %v771_v2  ;;  %v604_v43 = vmul.f32 %v2789_v33, %v2788_v27  ;;  %v2795_v54 = vld [vmem:[#allocation28_spill] sm:$0xff]  ;;  %v2796_v58 = vld [vmem:[#allocation34_spill] sm:$0xff]  ;;  %v2797_v46 = vld [vmem:[#allocation33_spill] sm:$0xff] }
  0x5c   : > { %v955_v17 = vadd.f32 %v947_v50, %v939_v8  ;;  %v612_v35 = vmul.f32 %v2791_v34, %v2790_v19  ;;  %v1130_v52 = vadd.f32 %v1122_v59, %v962_v28  ;;  %v772_v4 = vmul.f32 %v2793_v57, %v2792_v48  ;;  %v2798_v32 = vld [vmem:[#allocation35_spill] sm:$0xff]  ;;  %v2799_v2 = vld [vmem:[#allocation32_spill] sm:$0xff]  ;;  %v2801_v59 = vld [vmem:[#allocation38_spill] sm:$0xff] }
  0x5d   : > { %1203 = vst [vmem:[%s2472_s13] sm:$0xff] %v1195_v6  ;;  %v1123_v53 = vadd.f32 %v1115_v38, %v1107_v1  ;;  %v780_v11 = vmul.f32 %v2795_v54, %v2794_v36  ;;  %v795_v31 = vadd.f32 %v787_v39, %v619_v0  ;;  %v940_v12 = vmul.f32 %v2797_v46, %v2796_v58  ;;  %v2800_v13 = vld [vmem:[#allocation3_spill] sm:$0xff]  ;;  %v2804_v24 = vld [vmem:[#allocation36_spill] sm:$0xff]  ;;  %v2805_v28 = vld [vmem:[#allocation42_spill] sm:$0xff] }
  0x5e   : > { %v620_v55 = vadd.f32 %v612_v35, %v604_v43  ;;  %v948_v40 = vmul.f32 %v2799_v2, %v2798_v32  ;;  %v1196_v61 = vmul.f32 %v2800_v13, %v1130_v52  ;;  %v1108_v8 = vmul.f32 %v2802_v3, %v2801_v59  ;;  %v2803_v22 = vld [vmem:[#allocation39_spill] sm:$0xff]  ;;  %v2807_v29 = vld [vmem:[#allocation41_spill] sm:$0xff]  ;;  %v2810_v27 = vld [vmem:[#allocation46_spill] sm:$0xff] }
  0x5f   : > { %v788_v25 = vadd.f32 %v780_v11, %v772_v4  ;;  %v1116_v50 = vmul.f32 %v2804_v24, %v2803_v22  ;;  %v963_v41 = vadd.f32 %v955_v17, %v795_v31  ;;  %v2806_v0 = vld [vmem:[#allocation43_spill] sm:$0xff]  ;;  %v2808_v1 = vld [vmem:[#allocation45_spill] sm:$0xff]  ;;  %v2811_v43 = vld [vmem:[#allocation48_spill] sm:$0xff] }
  0x60   : > { %v956_v6 = vadd.f32 %v948_v40, %v940_v12  ;;  %v605_v10 = vmul.f32 %v2806_v0, %v2805_v28  ;;  %v613_v9 = vmul.f32 %v2808_v1, %v2807_v29  ;;  %1204 = vst [vmem:[%s2472_s13 + $0x8] sm:$0xff] %v1196_v61  ;;  %v2809_v39 = vld [vmem:[#allocation47_spill] sm:$0xff]  ;;  %v2812_v19 = vld [vmem:[#allocation44_spill] sm:$0xff]  ;;  %v2814_v48 = vld [vmem:[#allocation50_spill] sm:$0xff] }
  0x61   : > { %v796_v30 = vadd.f32 %v788_v25, %v620_v55  ;;  %v1124_v38 = vadd.f32 %v1116_v50, %v1108_v8  ;;  %v773_v33 = vmul.f32 %v2810_v27, %v2809_v39  ;;  %v781_v34 = vmul.f32 %v2812_v19, %v2811_v43  ;;  %v2813_v17 = vld [vmem:[#allocation51_spill] sm:$0xff]  ;;  %v2815_v4 = vld [vmem:[#allocation52_spill] sm:$0xff]  ;;  %v2816_v36 = vld [vmem:[#allocation49_spill] sm:$0xff] }
  0x62   : > { %v1131_v35 = vadd.f32 %v1123_v53, %v963_v41  ;;  %v621_v52 = vadd.f32 %v613_v9, %v605_v10  ;;  %v941_v57 = vmul.f32 %v2814_v48, %v2813_v17  ;;  %v949_v54 = vmul.f32 %v2816_v36, %v2815_v4  ;;  %v2817_v58 = vld [vmem:[#allocation55_spill] sm:$0xff]  ;;  %v2818_v55 = vld [vmem:[#allocation54_spill] sm:$0xff]  ;;  %v2819_v12 = vld [vmem:[#allocation56_spill] sm:$0xff] }
  0x63   : > { %v964_v11 = vadd.f32 %v956_v6, %v796_v30  ;;  %v789_v31 = vadd.f32 %v781_v34, %v773_v33  ;;  %v1109_v46 = vmul.f32 %v2818_v55, %v2817_v58  ;;  %v2820_v32 = vld [vmem:[#allocation53_spill] sm:$0xff]  ;;  %v2821_v40 = vld [vmem:[#allocation24_spill] sm:$0xff]  ;;  %v2823_v59 = vld [vmem:[#allocation58_spill] sm:$0xff] }
  0x64   : > { %v1117_v2 = vmul.f32 %v2820_v32, %v2819_v12  ;;  %v1197_v13 = vmul.f32 %v2821_v40, %v1131_v35  ;;  %v957_v61 = vadd.f32 %v949_v54, %v941_v57  ;;  %v2822_v53 = vld [vmem:[#allocation60_spill] sm:$0xff]  ;;  %v2824_v3 = vld [vmem:[#allocation61_spill] sm:$0xff]  ;;  %v2825_v41 = vld [vmem:[#allocation62_spill] sm:$0xff]  ;;  %v775_v12 = vmul.f32 %v2263_v21, %v2269_v44 }
  0x65   : > { %v606_v25 = vmul.f32 %v2822_v53, %v2158_v7  ;;  %v614_v8 = vmul.f32 %v2824_v3, %v2823_v59  ;;  %v1132_v22 = vadd.f32 %v1124_v38, %v964_v11  ;;  %v797_v24 = vadd.f32 %v789_v31, %v621_v52  ;;  %v2826_v0 = vld [vmem:[#allocation63_spill] sm:$0xff]  ;;  %v2829_v9 = vld [vmem:[#allocation65_spill] sm:$0xff]  ;;  %v2830_v39 = vld [vmem:[#allocation68_spill] sm:$0xff] }
  0x66   : > { %v1125_v50 = vadd.f32 %v1117_v2, %v1109_v46  ;;  %v774_v6 = vmul.f32 %v2168_v45, %v2825_v41  ;;  %1205 = vst [vmem:[%s2472_s13 + $0x10] sm:$0xff] %v1197_v13  ;;  %v2827_v10 = vld [vmem:[#allocation59_spill] sm:$0xff]  ;;  %v2831_v7 = vld [vmem:[#allocation64_spill] sm:$0xff]  ;;  %v2833_v19 = vld [vmem:[#allocation69_spill] sm:$0xff]  ;;  %v783_v32 = vmul.f32 %v2258_v60, %v2273_v20 }
  0x67   : > { %v622_v28 = vadd.f32 %v614_v8, %v606_v25  ;;  %v782_v29 = vmul.f32 %v2827_v10, %v2826_v0  ;;  %v2828_v1 = vld [vmem:[#allocation67_spill] sm:$0xff]  ;;  %v950_v27 = vmul.f32 %v2831_v7, %v2830_v39  ;;  %v2832_v33 = vld [vmem:[#allocation40_spill] sm:$0xff]  ;;  %v965_v38 = vadd.f32 %v957_v61, %v797_v24  ;;  %v2834_v34 = vld [vmem:[#allocation70_spill] sm:$0xff] }
  0x68   : > { %v942_v30 = vmul.f32 %v2829_v9, %v2828_v1  ;;  %v1198_v43 = vmul.f32 %v2832_v33, %v1132_v22  ;;  %v1110_v35 = vmul.f32 %v2834_v34, %v2833_v19  ;;  %v2835_v52 = vld [vmem:[#allocation71_spill] sm:$0xff]  ;;  %v2836_v17 = vld [vmem:[#allocation66_spill] sm:$0xff]  ;;  %v2839_v11 = vld [vmem:[#allocation73_spill] sm:$0xff]  ;;  %v791_v22 = vadd.f32 %v783_v32, %v775_v12 }
  0x69   : > { %v1118_v45 = vmul.f32 %v2836_v17, %v2835_v52  ;;  %v790_v48 = vadd.f32 %v782_v29, %v774_v6  ;;  %v2837_v4 = vld [vmem:[#allocation74_spill] sm:$0xff]  ;;  %v2838_v36 = vld [vmem:[#allocation75_spill] sm:$0xff]  ;;  %v2840_v31 = vld [vmem:[#allocation76_spill] sm:$0xff]  ;;  %v1133_v55 = vadd.f32 %v1125_v50, %v965_v38  ;;  %v776_v9 = vmul.f32 %v2359_v14, %v2363_v15 }
  0x6a   : > { %v958_v57 = vadd.f32 %v950_v27, %v942_v30  ;;  %v607_v54 = vmul.f32 %v2838_v36, %v2837_v4  ;;  %v615_v58 = vmul.f32 %v2840_v31, %v2839_v11  ;;  %1206 = vst [vmem:[%s2472_s13 + $0x18] sm:$0xff] %v1198_v43  ;;  %v2841_v13 = vld [vmem:[#allocation78_spill] sm:$0xff]  ;;  %v2842_v53 = vld [vmem:[#allocation79_spill] sm:$0xff]  ;;  %v2843_v25 = vld [vmem:[#allocation77_spill] sm:$0xff]  ;;  %v944_v7 = vmul.f32 %v2381_v16, %v2385_v63 }
  0x6b   : > { %v1126_v46 = vadd.f32 %v1118_v45, %v1110_v35  ;;  %v798_v2 = vadd.f32 %v790_v48, %v622_v28  ;;  %v943_v61 = vmul.f32 %v2841_v13, %v2292_v51  ;;  %v951_v59 = vmul.f32 %v2843_v25, %v2842_v53  ;;  %v2844_v3 = vld [vmem:[#allocation57_spill] sm:$0xff]  ;;  %v2846_v41 = vld [vmem:[#allocation82_spill] sm:$0xff]  ;;  %v2847_v6 = vld [vmem:[#allocation80_spill] sm:$0xff] }
  0x6c   : > { %v623_v40 = vadd.f32 %v615_v58, %v607_v54  ;;  %v1199_v8 = vmul.f32 %v2844_v3, %v1133_v55  ;;  %v2845_v24 = vld [vmem:[#allocation81_spill] sm:$0xff]  ;;  %v1119_v21 = vmul.f32 %v2847_v6, %v2846_v41  ;;  %v2848_v20 = vld [vmem:[#allocation84_spill] sm:$0xff]  ;;  %v2849_v28 = vld [vmem:[#allocation83_spill] sm:$0xff]  ;;  %v1112_v19 = vmul.f32 %v2406_v62, %v2410_v26 }
  0x6d   : > { %v1111_v50 = vmul.f32 %v2845_v24, %v2318_v5  ;;  %v966_v44 = vadd.f32 %v958_v57, %v798_v2  ;;  %v959_v0 = vadd.f32 %v951_v59, %v943_v61  ;;  %v608_v60 = vmul.f32 %v2848_v20, %v2336_v47  ;;  %v2850_v10 = vld [vmem:[#allocation85_spill] sm:$0xff]  ;;  %v2851_v47 = vld [vmem:[#allocation87_spill] sm:$0xff]  ;;  %v2852_v27 = vld [vmem:[#allocation86_spill] sm:$0xff] }
  0x6e   : > { %v616_v51 = vmul.f32 %v2850_v10, %v2849_v28  ;;  %1207 = vst [vmem:[%s2472_s13 + $0x20] sm:$0xff] %v1199_v8  ;;  %v799_v29 = vadd.f32 %v791_v22, %v623_v40  ;;  %v784_v5 = vmul.f32 %v2351_v49, %v2376_v42  ;;  %v952_v33 = vmul.f32 %v2852_v27, %v2851_v47  ;;  %v2853_v15 = vld [vmem:[#allocation72_spill] sm:$0xff] }
  0x6f   : > { %v1127_v1 = vadd.f32 %v1119_v21, %v1111_v50  ;;  %v1134_v30 = vadd.f32 %v1126_v46, %v966_v44  ;;  %v1120_v14 = vmul.f32 %v2397_v23, %v2416_v18 }
  0x70   : > { %v624_v39 = vadd.f32 %v616_v51, %v608_v60  ;;  %v967_v43 = vadd.f32 %v959_v0, %v799_v29  ;;  %v792_v38 = vadd.f32 %v784_v5, %v776_v9  ;;  %v960_v42 = vadd.f32 %v952_v33, %v944_v7 }
  0x71   : > { %v1200_v49 = vmul.f32 %v2853_v15, %v1134_v30  ;;  %v1128_v52 = vadd.f32 %v1120_v14, %v1112_v19 }
  0x72   : > { %v1135_v34 = vadd.f32 %v1127_v1, %v967_v43  ;;  %v800_v35 = vadd.f32 %v792_v38, %v624_v39 }
  0x73   : > { %1208 = vst [vmem:[%s2472_s13 + $0x28] sm:$0xff] %v1200_v49 }
  0x74   : > { %v1201_v63 = vmul.f32 %v2326_v37, %v1135_v34  ;;  %v968_v16 = vadd.f32 %v960_v42, %v800_v35 }
  0x76   : > { %1209 = vst [vmem:[%s2472_s13 + $0x30] sm:$0xff] %v1201_v63  ;;  %v1136_v17 = vadd.f32 %v1128_v52, %v968_v16 }
  0x78   : > { %v1202_v45 = vmul.f32 %v2420_v56, %v1136_v17 }
  0x7a   : > { %1210 = vst [vmem:[%s2472_s13 + $0x38] sm:$0xff] %v1202_v45 }
  0x7b PF: > { %s17_s23 = sadd.s32 1, %s1577_s23   ;;  %s2854_s21 = smov %s1573_s22 }
  0x7c   : > { %p14_p5 = scmp.ge.s32.totalorder %s17_s23, 4   ;;  %s2855_s22 = smov %s2857_s24 }
  0x7e   :  { %16 = sbr.rel (!%p14_p5) target bundleno = 2 (0x2), region = 106 }

// kernel: _lambda_.3
= control target key start
LH: loop header
LB: loop body
LE: loop exit
PB: predicated region body
PF: predicated region fallthrough
CT: control target
= control target key end

     0   :  { %10 = vsyncpa [#allocation3], 0  ;;  %s879_s18 = smov 0   ;;  %s881_s19 = smov 0   ;;  %s1098_s0 = inlined_call_operand.vmem [shape: f32[2], index: 0, kind: input, shape index: {}]   ;;  %s1099_s1 = inlined_call_operand.vmem [shape: f32[2,4,1024], index: 1, kind: input, shape index: {}]   ;;  %s1100_s2 = inlined_call_operand.vmem [shape: f32[2,8,1024], index: 2, kind: input, shape index: {}]   ;;  %s1101_s3 = inlined_call_operand.vmem [shape: f32[8,4], index: 3, kind: input, shape index: {}]   ;;  %s1102_s4 = inlined_call_operand.vmem [shape: f32[8,1], index: 4, kind: input, shape index: {}]   ;;  %s1103_s5 = inlined_call_operand.vmem [shape: f32[2,8,1024], index: 5, kind: output, shape index: {}]  }
   0x1   :  { %s883_s20 = smov 0  }
   0x2 LB: > { %s734_s21 = sadd.s32 4294967295, %s842_s20   ;;  %s28_s22 = sadd.s32 1, %s838_s19  ;;  %s842_s20 = sphi %s883_s20, %s16_s20   ;;  %s838_s19 = sphi %s881_s19, %s1112_s19   ;;  %s834_s18 = sphi %s879_s18, %s1111_s18  }
   0x3   : > { %p30_p0 = scmp.ge.s32.totalorder %s28_s22, 2  ;;  %p736_p1 = scmp.ge.s32.totalorder %s842_s20, 1 }
   0x4   : > { %p180_p2 = scmp.lt.s32.totalorder %s842_s20, 3  ;;  %p904_p4 = scmp.eq.s32.totalorder %s734_s21, 0 }
   0x5   : > { %s1114_s22 = smov (%p30_p0, %s28_s22), 0  ;;  %s193_s27 = sshll.u32 %s1098_s0, 4  ;;  %s194_s27 = int_to_ptr.vmem [resolvable:$true] %s193_s27 }
   0x6   : > { %p900_p3 = pnand %p736_p1, %p180_p2  ;;  %s801_s28 = scalar_lea.vmem %s194_s27, 16 }
   0x7   : > { %p802_p7 = scmp.ne.s32.totalorder %s194_s27, %s801_s28  ;;  %p809_p11 = scmp.lt.s32.totalorder %s194_s27, %s194_s27 }
   0x8   : > { %p760_p5 = pneg %p900_p3  ;;  %p810_p12 = scmp.lt.s32.totalorder %s801_s28, %s801_s28 }
   0xa   : > { %p761_p6 = pnand %p904_p4, %p760_p5  ;;  %p811_p13 = por %p810_p12, %p809_p11 }
   0xc   : > { %p803_p8 = pneg %p761_p6 }
   0xe   : > { %p804_p9 = pnand %p803_p8, %p802_p7 }
  0x10   : > { %p805_p10 = pneg %p804_p9 }
  0x12   : > { %p812_p0 = pnand %p811_p13, %p805_p10 }
  0x14   : > { %815 = shalt.err (!%p812_p0)
}
  0x15   : > { %s844_s29 = smov [#allocation2]   ;;  %238 = sbr.rel (%p900_p3) target bundleno = 187 (0xbb), region = 40 }
  0x16   : > { %763 = dma.vmem_to_smem (!%p761_p6), %s194_s27, 16, %s844_s29, [#allocation3]  }
  0x1c   : > { %829 = dma.done.wait (%p904_p4), [#allocation3], 16  }
  0x1d   : > { %831 = vsyncadd (%p904_p4), [#allocation3], 4294967280 }
  0x1e   : > { %244 = sfence }
  0x1f   : > { %v314_v0 = vld [vmem:[%s1101_s3] sm:$0xff]  ;;  %v845_v1 = vmov 0   ;;  %v846_v2 = vmov 2   ;;  %v847_v3 = vmov 1   ;;  %v848_v4 = vmov 3   ;;  %p285_p1 = scmp.lt.s32.totalorder %s834_s18, 1 }
  0x20   : > { %795 = vset.pattern.permute.xlu0 %v845_v1  ;;  %797 = vset.pattern.permute.xlu1 %v846_v2  ;;  %v559_v5 = vld [vmem:[%s1102_s4] sm:$0xff]  ;;  %v322_v6 = vlaneseq  ;;  %s943_s13 = sld [smem:[#allocation2]]  ;;  %s962_s15 = sld [smem:[#allocation2 + $0x1]] }
  0x21   : > { %318 = vperm.xlu0 %795, %v314_v0   ;;  %436 = vperm.xlu1 %797, %v314_v0   ;;  %s1116_s18 = smov (!%p285_p1, %s834_s18), 1 }
  0x22   : > { %s753_s9 = sshll.u32 %s1116_s18, 5  ;;  %v323_v7 = vshrl.u32 %v322_v6, 7  ;;  %s754_s14 = sshll.u32 %s1116_s18, 6 }
  0x23   : > { %s292_s12 = scalar_lea.vmem %s1099_s1, %s753_s9  ;;  %s302_s21 = scalar_lea.vmem %s1100_s2, %s754_s14 }
  0x24   : > { %v935_v8 = vld [vmem:[%s292_s12 + $0x2] ss:$4 sm:$0xff]  ;;  %v937_v9 = vsub.s32 0, %v323_v7  ;;  %v939_v10 = vsub.s32 1, %v323_v7  ;;  %v941_v11 = vsub.s32 2, %v323_v7  ;;  %v945_v12 = vsub.s32 3, %v323_v7  ;;  %s312_s25 = scalar_lea.vmem %s1103_s5, %s754_s14 }
  0x25   : > { %796 = vset.pattern.permute.xlu0 %v847_v3  ;;  %798 = vset.pattern.permute.xlu1 %v848_v4  ;;  %v947_v13 = vsub.s32 4, %v323_v7  ;;  %v949_v14 = vsub.s32 5, %v323_v7  ;;  %v951_v15 = vld [vmem:[%s292_s12] ss:$4 sm:$0xff]  ;;  %v954_v16 = vsub.s32 6, %v323_v7  ;;  %v956_v17 = vsub.s32 7, %v323_v7 }
  0x26   : > { %373 = vperm.xlu0 %796, %v314_v0   ;;  %499 = vperm.xlu1 %798, %v314_v0   ;;  %v443_v18 = vrot.slane %v935_v8, %v937_v9  ;;  %v447_v19 = vrot.slane %v935_v8, %v939_v10  ;;  %v451_v20 = vrot.slane %v935_v8, %v941_v11  ;;  %v972_v24 = vld [vmem:[%s292_s12 + $0x1] ss:$4 sm:$0xff]  ;;  %v995_v33 = vld [vmem:[%s292_s12 + $0x3] ss:$4 sm:$0xff]  ;;  %v582_v46 = vstv %s943_s13 }
  0x27   : > { %v455_v21 = vrot.slane %v935_v8, %v945_v12  ;;  %v459_v22 = vrot.slane %v935_v8, %v947_v13  ;;  %v463_v23 = vrot.slane %v935_v8, %v949_v14  ;;  %v467_v25 = vrot.slane %v935_v8, %v954_v16  ;;  %v574_v42 = vld [vmem:[%s302_s21] sm:$0xff]  ;;  %v575_v43 = vld [vmem:[%s302_s21 + $0x8] sm:$0xff]  ;;  %v576_v48 = vld [vmem:[%s302_s21 + $0x10] sm:$0xff] }
  0x28   : > { %v471_v26 = vrot.slane %v935_v8, %v956_v17  ;;  %v325_v27 = vrot.slane %v951_v15, %v937_v9  ;;  %v329_v28 = vrot.slane %v951_v15, %v939_v10  ;;  %v333_v29 = vrot.slane %v951_v15, %v941_v11  ;;  %v577_v49 = vld [vmem:[%s302_s21 + $0x18] sm:$0xff]  ;;  %v578_v50 = vld [vmem:[%s302_s21 + $0x20] sm:$0xff]  ;;  %v579_v55 = vld [vmem:[%s302_s21 + $0x28] sm:$0xff] }
  0x29   : > { %v337_v30 = vrot.slane %v951_v15, %v945_v12  ;;  %v341_v31 = vrot.slane %v951_v15, %v947_v13  ;;  %v345_v32 = vrot.slane %v951_v15, %v949_v14  ;;  %v349_v34 = vrot.slane %v951_v15, %v954_v16  ;;  %v580_v56 = vld [vmem:[%s302_s21 + $0x30] sm:$0xff]  ;;  %v581_v57 = vld [vmem:[%s302_s21 + $0x38] sm:$0xff] }
  0x2a   : > { %799 = vset.pattern.permute.xlu1 %v845_v1  ;;  %800 = vset.pattern.permute.xlu0 %v845_v1  ;;  %v353_v35 = vrot.slane %v951_v15, %v956_v17  ;;  %v380_v36 = vrot.slane %v972_v24, %v937_v9  ;;  %v384_v37 = vrot.slane %v972_v24, %v939_v10  ;;  %v1029_v58 = vstv %s962_s15 }
  0x2b   : > { %562 = vperm.xlu1 %799, %v559_v5   ;;  %v388_v38 = vrot.slane %v972_v24, %v941_v11  ;;  %v392_v39 = vrot.slane %v972_v24, %v945_v12  ;;  %v396_v40 = vrot.slane %v972_v24, %v947_v13  ;;  %v400_v41 = vrot.slane %v972_v24, %v949_v14 }
  0x2c   : > { %v404_v44 = vrot.slane %v972_v24, %v954_v16  ;;  %v408_v45 = vrot.slane %v972_v24, %v956_v17  ;;  %v526_v59 = vrot.slane %v995_v33, %v949_v14  ;;  %v530_v60 = vrot.slane %v995_v33, %v954_v16 }
  0x2d   : > { %v534_v61 = vrot.slane %v995_v33, %v956_v17  ;;  %v1037_v0 = vmul.f32 %v582_v46, %v574_v42  ;;  %v1039_v1 = vmul.f32 %v582_v46, %v575_v43  ;;  %v1041_v2 = vmul.f32 %v582_v46, %v576_v48 }
  0x2e   : > { %v1043_v3 = vmul.f32 %v582_v46, %v577_v49  ;;  %v1045_v4 = vmul.f32 %v582_v46, %v578_v50  ;;  %v1047_v5 = vmul.f32 %v582_v46, %v579_v55  ;;  %v1049_v6 = vmul.f32 %v582_v46, %v580_v56 }
  0x2f   : > { %v1051_v7 = vmul.f32 %v582_v46, %v581_v57 }
  0xa0   : > { %v319_v62 = vpop.permute.xlu0 %318  ;;  %v437_v63 = vpop.permute.xlu1 %436 }
  0xa1   : > { %v480_v8 = vmul.f32 %v443_v18, %v437_v63  ;;  %v481_v14 = vmul.f32 %v447_v19, %v437_v63  ;;  %v482_v15 = vmul.f32 %v451_v20, %v437_v63  ;;  %v483_v16 = vmul.f32 %v455_v21, %v437_v63 }
  0xa2   : > { %v484_v17 = vmul.f32 %v459_v22, %v437_v63  ;;  %v485_v24 = vmul.f32 %v463_v23, %v437_v63  ;;  %v486_v42 = vmul.f32 %v467_v25, %v437_v63  ;;  %v487_v43 = vmul.f32 %v471_v26, %v437_v63 }
  0xa3   : > { %v362_v48 = vmul.f32 %v325_v27, %v319_v62  ;;  %v363_v54 = vmul.f32 %v329_v28, %v319_v62  ;;  %v364_v49 = vmul.f32 %v333_v29, %v319_v62  ;;  %v365_v53 = vmul.f32 %v337_v30, %v319_v62 }
  0xa4   : > { %v366_v52 = vmul.f32 %v341_v31, %v319_v62  ;;  %v367_v55 = vmul.f32 %v345_v32, %v319_v62  ;;  %v368_v51 = vmul.f32 %v349_v34, %v319_v62  ;;  %v369_v56 = vmul.f32 %v353_v35, %v319_v62 }
  0xa5   : > { %v374_v50 = vpop.permute.xlu0 %373  ;;  %v500_v23 = vpop.permute.xlu1 %499 }
  0xa6   : > { %v417_v47 = vmul.f32 %v380_v36, %v374_v50  ;;  %v418_v46 = vmul.f32 %v384_v37, %v374_v50  ;;  %v419_v57 = vmul.f32 %v388_v38, %v374_v50  ;;  %v420_v18 = vmul.f32 %v392_v39, %v374_v50 }
  0xa7   : > { %v421_v19 = vmul.f32 %v396_v40, %v374_v50  ;;  %v422_v20 = vmul.f32 %v400_v41, %v374_v50  ;;  %v423_v21 = vmul.f32 %v404_v44, %v374_v50  ;;  %v424_v22 = vmul.f32 %v408_v45, %v374_v50 }
  0xa8   : > { %v425_v25 = vadd.f32 %v417_v47, %v362_v48  ;;  %v426_v26 = vadd.f32 %v418_v46, %v363_v54  ;;  %v427_v27 = vadd.f32 %v419_v57, %v364_v49  ;;  %v428_v28 = vadd.f32 %v420_v18, %v365_v53 }
  0xa9   : > { %v429_v29 = vadd.f32 %v421_v19, %v366_v52  ;;  %v430_v30 = vadd.f32 %v422_v20, %v367_v55  ;;  %v431_v63 = vadd.f32 %v423_v21, %v368_v51  ;;  %v432_v31 = vadd.f32 %v424_v22, %v369_v56 }
  0xaa   : > { %v488_v32 = vadd.f32 %v480_v8, %v425_v25  ;;  %v489_v34 = vadd.f32 %v481_v14, %v426_v26  ;;  %v490_v35 = vadd.f32 %v482_v15, %v427_v27  ;;  %v491_v36 = vadd.f32 %v483_v16, %v428_v28  ;;  %v563_v62 = vpop.permute.xlu1 %562 }
  0xab   : > { %v492_v37 = vadd.f32 %v484_v17, %v429_v29  ;;  %v493_v38 = vadd.f32 %v485_v24, %v430_v30  ;;  %v494_v39 = vadd.f32 %v486_v42, %v431_v63  ;;  %v495_v40 = vadd.f32 %v487_v43, %v432_v31 }
  0xac   : > { %v1106_v41 = vrot.slane %v995_v33, %v937_v9  ;;  %v1107_v45 = vrot.slane %v995_v33, %v939_v10  ;;  %v1108_v51 = vrot.slane %v995_v33, %v941_v11  ;;  %v1109_v53 = vrot.slane %v995_v33, %v945_v12 }
  0xad   : > { %v1110_v8 = vrot.slane %v995_v33, %v947_v13  ;;  %v548_v15 = vmul.f32 %v526_v59, %v500_v23  ;;  %v549_v9 = vmul.f32 %v530_v60, %v500_v23  ;;  %v550_v16 = vmul.f32 %v534_v61, %v500_v23 }
  0xae   : > { %v543_v44 = vmul.f32 %v1106_v41, %v500_v23  ;;  %v544_v47 = vmul.f32 %v1107_v45, %v500_v23  ;;  %v545_v52 = vmul.f32 %v1108_v51, %v500_v23  ;;  %v546_v54 = vmul.f32 %v1109_v53, %v500_v23 }
  0xaf   : > { %v547_v14 = vmul.f32 %v1110_v8, %v500_v23  ;;  %v556_v11 = vadd.f32 %v548_v15, %v493_v38  ;;  %v557_v48 = vadd.f32 %v549_v9, %v494_v39  ;;  %v558_v49 = vadd.f32 %v550_v16, %v495_v40 }
  0xb0   : > { %v551_v17 = vadd.f32 %v543_v44, %v488_v32  ;;  %v552_v24 = vadd.f32 %v544_v47, %v489_v34  ;;  %v553_v10 = vadd.f32 %v545_v52, %v490_v35  ;;  %v554_v42 = vadd.f32 %v546_v54, %v491_v36 }
  0xb1   : > { %v555_v43 = vadd.f32 %v547_v14, %v492_v37  ;;  %v570_v57 = vadd.f32 %v563_v62, %v556_v11  ;;  %v571_v13 = vadd.f32 %v563_v62, %v557_v48  ;;  %v572_v33 = vadd.f32 %v563_v62, %v558_v49 }
  0xb2   : > { %v565_v50 = vadd.f32 %v563_v62, %v551_v17  ;;  %v566_v12 = vadd.f32 %v563_v62, %v552_v24  ;;  %v567_v55 = vadd.f32 %v563_v62, %v553_v10  ;;  %v568_v56 = vadd.f32 %v563_v62, %v554_v42 }
  0xb3   : > { %v569_v46 = vadd.f32 %v563_v62, %v555_v43  ;;  %v598_v20 = vmul.f32 %v1029_v58, %v570_v57  ;;  %v599_v21 = vmul.f32 %v1029_v58, %v571_v13  ;;  %v600_v22 = vmul.f32 %v1029_v58, %v572_v33 }
  0xb4   : > { %v593_v59 = vmul.f32 %v1029_v58, %v565_v50  ;;  %v594_v60 = vmul.f32 %v1029_v58, %v566_v12  ;;  %v595_v61 = vmul.f32 %v1029_v58, %v567_v55  ;;  %v596_v18 = vmul.f32 %v1029_v58, %v568_v56 }
  0xb5   : > { %v597_v19 = vmul.f32 %v1029_v58, %v569_v46  ;;  %v606_v29 = vadd.f32 %v598_v20, %v1047_v5  ;;  %v607_v30 = vadd.f32 %v599_v21, %v1049_v6  ;;  %v608_v63 = vadd.f32 %v600_v22, %v1051_v7 }
  0xb6   : > { %v601_v23 = vadd.f32 %v593_v59, %v1037_v0  ;;  %v602_v25 = vadd.f32 %v594_v60, %v1039_v1  ;;  %v603_v26 = vadd.f32 %v595_v61, %v1041_v2  ;;  %v604_v27 = vadd.f32 %v596_v18, %v1043_v3 }
  0xb7   : > { %v605_v28 = vadd.f32 %v597_v19, %v1045_v4  ;;  %614 = vst [vmem:[%s312_s25 + $0x28] sm:$0xff] %v606_v29  ;;  %615 = vst [vmem:[%s312_s25 + $0x30] sm:$0xff] %v607_v30 }
  0xb8   : > { %609 = vst [vmem:[%s312_s25] sm:$0xff] %v601_v23  ;;  %610 = vst [vmem:[%s312_s25 + $0x8] sm:$0xff] %v602_v25 }
  0xb9   : > { %611 = vst [vmem:[%s312_s25 + $0x10] sm:$0xff] %v603_v26  ;;  %612 = vst [vmem:[%s312_s25 + $0x18] sm:$0xff] %v604_v27 }
  0xba   : > { %613 = vst [vmem:[%s312_s25 + $0x20] sm:$0xff] %v605_v28  ;;  %616 = vst [vmem:[%s312_s25 + $0x38] sm:$0xff] %v608_v63 }
  0xbb PF: > { %s16_s20 = sadd.s32 1, %s842_s20   ;;  %s1111_s18 = smov %s838_s19 }
  0xbc   : > { %p13_p2 = scmp.ge.s32.totalorder %s16_s20, 4   ;;  %s1112_s19 = smov %s1114_s22 }
  0xbe   :  { %15 = sbr.rel (!%p13_p2) target bundleno = 2 (0x2), region = 81 }
  0xc5   :  { %647 = vsyncpa [#allocation3], 1 }
  0xc6   :  { %649 = vsyncpa [#allocation3 + $0x1], 1 }

</bundles_post_ra>
